<compile_context>
chip_gen: v7x
topology: tpu7x:2x2x1
jax: 0.10.0
libtpu: 0.0.40
codegen_flags: <defaults>
</compile_context>

<pallas_src>
import jax
import jax.numpy as jnp
from jax.experimental import pallas as pl
from jax.experimental.pallas import tpu as pltpu


def _encoder_lstm_kernel(x_ref, len_ref, wih_ref, whh_ref, b_ref, we2d_ref, be2d_ref,
                         ctx_ref, h_ref, c_ref, dec_ref):
    B, T, E = x_ref.shape
    H = whh_ref.shape[0]

    # ---- Phase 1: input projection for ALL timesteps as one MXU matmul. ----
    x_all = x_ref[...].reshape(B * T, E)                               # (B*T, E)
    gx = (jnp.dot(x_all, wih_ref[...], preferred_element_type=jnp.float32)
          + b_ref[...])                                                # (B*T, 4H)
    gx = gx.reshape(B, T, 4 * H)                                       # (B, T, 4H)

    # ---- Length mask computed in-kernel (no (T,B,1) HBM mask stream). ----
    lengths = len_ref[...]                                             # (B, 1) int32
    t_iota = jax.lax.broadcasted_iota(jnp.int32, (B, T), 1)
    mask_all = (t_iota < lengths).astype(jnp.float32)                  # (B, T)

    w_hh = whh_ref[...]                                                # (H, 4H)

    h = jnp.zeros((B, H), jnp.float32)
    c = jnp.zeros((B, H), jnp.float32)

    # ---- Phase 2: serial recurrence, fully unrolled (T static & small). ----
    # Note: assumes T >= 1 (a zero-length sequence batch is not meaningful here).
    for t in range(T):
        gates = gx[:, t, :] + jnp.dot(h, w_hh,
                                      preferred_element_type=jnp.float32)  # (B, 4H)
        i = jax.nn.sigmoid(gates[:, 0:H])
        f = jax.nn.sigmoid(gates[:, H:2 * H])
        g = jnp.tanh(gates[:, 2 * H:3 * H])
        o = jax.nn.sigmoid(gates[:, 3 * H:4 * H])

        c_new = f * c + i * g
        h_new = o * jnp.tanh(c_new)

        m = mask_all[:, t:t + 1]                                       # (B, 1)
        h = m * h_new + (1.0 - m) * h
        c = m * c_new + (1.0 - m) * c

        # pad_packed_sequence: outputs beyond the sequence length are zero.
        ctx_ref[:, t:t + 1, :] = (m * h_new)[:, None, :].astype(ctx_ref.dtype)

    h_ref[...] = h.astype(h_ref.dtype)
    c_ref[...] = c.astype(c_ref.dtype)
    dec_ref[...] = jnp.tanh(
        jnp.dot(h, we2d_ref[...], preferred_element_type=jnp.float32)
        + be2d_ref[...]).astype(dec_ref.dtype)


def encoder_lstm_pallas(embeds_btE, lengths, w_ih, w_hh, bias, w_e2d, b_e2d):
    """embeds_btE: (B, T, E) f32; lengths: (B,) int32 (sorted descending).
    Returns ctx (B, T, H), decoder_init (B, H), h_t (B, H), c_t (B, H)."""
    B, T, E = embeds_btE.shape
    H = w_hh.shape[0]

    lengths2d = lengths.reshape(B, 1).astype(jnp.int32)
    bias2d = bias.reshape(1, 4 * H)
    b_e2d2d = b_e2d.reshape(1, H)

    ctx, h_t, c_t, dec = pl.pallas_call(
        _encoder_lstm_kernel,
        out_shape=(
            jax.ShapeDtypeStruct((B, T, H), jnp.float32),   # ctx (batch-first)
            jax.ShapeDtypeStruct((B, H), jnp.float32),      # h_t
            jax.ShapeDtypeStruct((B, H), jnp.float32),      # c_t
            jax.ShapeDtypeStruct((B, H), jnp.float32),      # decoder_init
        ),
        grid_spec=pltpu.PrefetchScalarGridSpec(
            num_scalar_prefetch=0,
            grid=(1,),                                       # single step: everything in-kernel
            in_specs=[
                pl.BlockSpec((B, T, E), lambda i: (0, 0, 0)),    # embeds (batch-first)
                pl.BlockSpec((B, 1), lambda i: (0, 0)),          # lengths
                pl.BlockSpec((E, 4 * H), lambda i: (0, 0)),      # W_ih  (in, 4H)
                pl.BlockSpec((H, 4 * H), lambda i: (0, 0)),      # W_hh  (H, 4H)
                pl.BlockSpec((1, 4 * H), lambda i: (0, 0)),      # bias
                pl.BlockSpec((H, H), lambda i: (0, 0)),          # encoder2decoder W
                pl.BlockSpec((1, H), lambda i: (0, 0)),          # encoder2decoder b
            ],
            out_specs=[
                pl.BlockSpec((B, T, H), lambda i: (0, 0, 0)),
                pl.BlockSpec((B, H), lambda i: (0, 0)),
                pl.BlockSpec((B, H), lambda i: (0, 0)),
                pl.BlockSpec((B, H), lambda i: (0, 0)),
            ],
        ),
        compiler_params=pltpu.CompilerParams(
            dimension_semantics=("arbitrary",)),
    )(embeds_btE, lengths2d, w_ih, w_hh, bias2d, w_e2d, b_e2d2d)

    return ctx, dec, h_t, c_t


def encoder_lstm_reference(embeds_btE, lengths, w_ih, w_hh, bias, w_e2d, b_e2d):
    """Pure-JAX reference (lax.scan) mirroring packed-LSTM semantics."""
    B, T, E = embeds_btE.shape
    H = w_hh.shape[0]
    x_tbe = jnp.transpose(embeds_btE, (1, 0, 2))
    mask = (jnp.arange(T)[:, None] < lengths[None, :]).astype(jnp.float32)[:, :, None]

    def step(carry, xs):
        h, c = carry
        x, m = xs
        gates = x @ w_ih + h @ w_hh + bias
        i = jax.nn.sigmoid(gates[:, :H])
        f = jax.nn.sigmoid(gates[:, H:2 * H])
        g = jnp.tanh(gates[:, 2 * H:3 * H])
        o = jax.nn.sigmoid(gates[:, 3 * H:])
        c_new = f * c + i * g
        h_new = o * jnp.tanh(c_new)
        h2 = m * h_new + (1.0 - m) * h
        c2 = m * c_new + (1.0 - m) * c
        return (h2, c2), m * h_new

    (h_t, c_t), ctx_tbh = jax.lax.scan(
        step, (jnp.zeros((B, H)), jnp.zeros((B, H))), (x_tbe, mask))
    dec = jnp.tanh(h_t @ w_e2d + b_e2d)
    return jnp.transpose(ctx_tbh, (1, 0, 2)), dec, h_t, c_t


if __name__ == "__main__":
    # Module hyperparameters (small, consistent with EncoderLSTM.__init__).
    vocab_size, embedding_size, hidden_size = 20, 16, 32
    padding_idx, num_layers, bidirectional = 0, 1, False
    B, T = 2, 8

    key = jax.random.PRNGKey(0)
    ks = jax.random.split(key, 8)

    # Deterministic parameter init (synthetic, not a checkpoint).
    # NB: weights are stored as (in_features, 4H) / (in, out); loading real PyTorch
    # checkpoints ((4H, in) / (out, in)) would need a transpose in glue, not the kernel.
    emb_table = 0.1 * jax.random.normal(ks[0], (vocab_size, embedding_size), jnp.float32)
    emb_table = emb_table.at[padding_idx].set(0.0)                    # padding_idx row = 0
    w_ih = 0.1 * jax.random.normal(ks[1], (embedding_size, 4 * hidden_size), jnp.float32)
    w_hh = 0.1 * jax.random.normal(ks[2], (hidden_size, 4 * hidden_size), jnp.float32)
    b_ih = 0.1 * jax.random.normal(ks[3], (4 * hidden_size,), jnp.float32)
    b_hh = 0.1 * jax.random.normal(ks[4], (4 * hidden_size,), jnp.float32)
    bias = b_ih + b_hh
    w_e2d = 0.1 * jax.random.normal(ks[5], (hidden_size, hidden_size), jnp.float32)  # (in, out)
    b_e2d = 0.1 * jax.random.normal(ks[6], (hidden_size,), jnp.float32)

    # Inputs: vocab indices (B, T) with lengths sorted descending (packed-sequence convention).
    inputs = jax.random.randint(ks[7], (B, T), 1, vocab_size, dtype=jnp.int32)
    lengths = jnp.array([T, T - 3], dtype=jnp.int32)
    pad_mask = jnp.arange(T)[None, :] < lengths[:, None]
    inputs = jnp.where(pad_mask, inputs, padding_idx)

    # Embedding lookup + dropout (eval-mode identity) stay in plain-JAX glue.
    embeds = jnp.take(emb_table, inputs, axis=0)                      # (B, T, E)
    # TODO(synk): nn.Dropout is identity in eval mode; training-mode dropout not implemented.

    ctx, dec_init, h_t, c_t = jax.block_until_ready(
        encoder_lstm_pallas(embeds, lengths, w_ih, w_hh, bias, w_e2d, b_e2d))

    ctx_r, dec_r, h_r, c_r = encoder_lstm_reference(
        embeds, lengths, w_ih, w_hh, bias, w_e2d, b_e2d)

    assert jnp.allclose(ctx, ctx_r, atol=1e-5), "ctx mismatch"
    assert jnp.allclose(dec_init, dec_r, atol=1e-5), "decoder_init mismatch"
    assert jnp.allclose(h_t, h_r, atol=1e-5), "h_t mismatch"
    assert jnp.allclose(c_t, c_r, atol=1e-5), "c_t mismatch"

    print("KERNEL_OK")
</pallas_src>

<mosaic_0001>
module attributes {stable_mosaic.version = 11 : i64} {
  func.func @_encoder_lstm_kernel(%arg0: i32, %arg1: memref<2x8x16xf32, #tpu.memory_space<vmem>>, %arg2: memref<2x1xi32, #tpu.memory_space<vmem>>, %arg3: memref<16x128xf32, #tpu.memory_space<vmem>>, %arg4: memref<32x128xf32, #tpu.memory_space<vmem>>, %arg5: memref<1x128xf32, #tpu.memory_space<vmem>>, %arg6: memref<32x32xf32, #tpu.memory_space<vmem>>, %arg7: memref<1x32xf32, #tpu.memory_space<vmem>>, %arg8: memref<2x8x32xf32, #tpu.memory_space<vmem>>, %arg9: memref<2x32xf32, #tpu.memory_space<vmem>>, %arg10: memref<2x32xf32, #tpu.memory_space<vmem>>, %arg11: memref<2x32xf32, #tpu.memory_space<vmem>>) attributes {dimension_semantics = [#tpu.dimension_semantics<arbitrary>], iteration_bounds = array<i64: 1>, scalar_prefetch = 0 : i64, scratch_operands = 0 : i64, tpu.core_type = #tpu.core_type<tc>, window_params = [{pipeline_mode = #tpu.pipeline_mode<synchronous>, transform_indices = @transform_0, window_bounds = array<i64: 2, 8, 16>}, {pipeline_mode = #tpu.pipeline_mode<synchronous>, transform_indices = @transform_1, window_bounds = array<i64: 2, 1>}, {pipeline_mode = #tpu.pipeline_mode<synchronous>, transform_indices = @transform_2, window_bounds = array<i64: 16, 128>}, {pipeline_mode = #tpu.pipeline_mode<synchronous>, transform_indices = @transform_3, window_bounds = array<i64: 32, 128>}, {pipeline_mode = #tpu.pipeline_mode<synchronous>, transform_indices = @transform_4, window_bounds = array<i64: 1, 128>}, {pipeline_mode = #tpu.pipeline_mode<synchronous>, transform_indices = @transform_5, window_bounds = array<i64: 32, 32>}, {pipeline_mode = #tpu.pipeline_mode<synchronous>, transform_indices = @transform_6, window_bounds = array<i64: 1, 32>}, {pipeline_mode = #tpu.pipeline_mode<synchronous>, transform_indices = @transform_7, window_bounds = array<i64: 2, 8, 32>}, {pipeline_mode = #tpu.pipeline_mode<synchronous>, transform_indices = @transform_8, window_bounds = array<i64: 2, 32>}, {pipeline_mode = #tpu.pipeline_mode<synchronous>, transform_indices = @transform_9, window_bounds = array<i64: 2, 32>}, {pipeline_mode = #tpu.pipeline_mode<synchronous>, transform_indices = @transform_10, window_bounds = array<i64: 2, 32>}]} {
    %c0 = arith.constant 0 : index
    %c0_0 = arith.constant 0 : index
    %c0_1 = arith.constant 0 : index
    %0 = vector.load %arg1[%c0, %c0_0, %c0_1] : memref<2x8x16xf32, #tpu.memory_space<vmem>>, vector<2x8x16xf32>
    %1 = vector.shape_cast %0 : vector<2x8x16xf32> to vector<16x16xf32>
    %c0_2 = arith.constant 0 : index
    %c0_3 = arith.constant 0 : index
    %2 = vector.load %arg3[%c0_2, %c0_3] : memref<16x128xf32, #tpu.memory_space<vmem>>, vector<16x128xf32>
    %cst = arith.constant dense<0.000000e+00> : vector<16x128xf32>
    %3 = tpu.matmul %1, %2, %cst {dimension_numbers = #tpu.dot_dimension_numbers<[1], [0], [0], [1], [0, 0, 1, 1], [], []>} : vector<16x16xf32>, vector<16x128xf32>, vector<16x128xf32> -> vector<16x128xf32>
    %c0_4 = arith.constant 0 : index
    %c0_5 = arith.constant 0 : index
    %4 = vector.load %arg5[%c0_4, %c0_5] : memref<1x128xf32, #tpu.memory_space<vmem>>, vector<1x128xf32>
    %5 = vector.broadcast %4 : vector<1x128xf32> to vector<16x128xf32>
    %6 = arith.addf %3, %5 : vector<16x128xf32>
    %7 = vector.shape_cast %6 : vector<16x128xf32> to vector<2x8x128xf32>
    %c0_6 = arith.constant 0 : index
    %c0_7 = arith.constant 0 : index
    %8 = vector.load %arg2[%c0_6, %c0_7] : memref<2x1xi32, #tpu.memory_space<vmem>>, vector<2x1xi32>
    %9 = tpu.iota {dimensions = array<i32: 1>} : vector<2x8xi32>
    %10 = vector.broadcast %8 : vector<2x1xi32> to vector<2x8xi32>
    %11 = arith.cmpi slt, %9, %10 : vector<2x8xi32>
    %12 = arith.extui %11 : vector<2x8xi1> to vector<2x8xi32>
    %13 = arith.sitofp %12 : vector<2x8xi32> to vector<2x8xf32>
    %c0_8 = arith.constant 0 : index
    %c0_9 = arith.constant 0 : index
    %14 = vector.load %arg4[%c0_8, %c0_9] : memref<32x128xf32, #tpu.memory_space<vmem>>, vector<32x128xf32>
    %cst_10 = arith.constant 0.000000e+00 : f32
    %15 = vector.broadcast %cst_10 : f32 to vector<2x32xf32>
    %cst_11 = arith.constant 0.000000e+00 : f32
    %16 = vector.broadcast %cst_11 : f32 to vector<2x32xf32>
    %17 = vector.extract_strided_slice %7 {offsets = [0, 0, 0], sizes = [2, 1, 128], strides = [1, 1, 1]} : vector<2x8x128xf32> to vector<2x1x128xf32>
    %18 = vector.shape_cast %17 : vector<2x1x128xf32> to vector<2x128xf32>
    %cst_12 = arith.constant dense<0.000000e+00> : vector<2x128xf32>
    %19 = tpu.matmul %15, %14, %cst_12 {dimension_numbers = #tpu.dot_dimension_numbers<[1], [0], [0], [1], [0, 0, 1, 1], [], []>} : vector<2x32xf32>, vector<32x128xf32>, vector<2x128xf32> -> vector<2x128xf32>
    %20 = arith.addf %18, %19 : vector<2x128xf32>
    %21 = vector.extract_strided_slice %20 {offsets = [0, 0], sizes = [2, 32], strides = [1, 1]} : vector<2x128xf32> to vector<2x32xf32>
    %22 = arith.negf %21 : vector<2x32xf32>
    %23 = math.exp %22 : vector<2x32xf32>
    %cst_13 = arith.constant 1.000000e+00 : f32
    %24 = vector.broadcast %cst_13 : f32 to vector<2x32xf32>
    %25 = arith.addf %24, %23 : vector<2x32xf32>
    %26 = arith.divf %24, %25 : vector<2x32xf32>
    %27 = vector.extract_strided_slice %20 {offsets = [0, 32], sizes = [2, 32], strides = [1, 1]} : vector<2x128xf32> to vector<2x32xf32>
    %28 = arith.negf %27 : vector<2x32xf32>
    %29 = math.exp %28 : vector<2x32xf32>
    %cst_14 = arith.constant 1.000000e+00 : f32
    %30 = vector.broadcast %cst_14 : f32 to vector<2x32xf32>
    %31 = arith.addf %30, %29 : vector<2x32xf32>
    %32 = arith.divf %30, %31 : vector<2x32xf32>
    %33 = vector.extract_strided_slice %20 {offsets = [0, 64], sizes = [2, 32], strides = [1, 1]} : vector<2x128xf32> to vector<2x32xf32>
    %34 = math.tanh %33 : vector<2x32xf32>
    %35 = vector.extract_strided_slice %20 {offsets = [0, 96], sizes = [2, 32], strides = [1, 1]} : vector<2x128xf32> to vector<2x32xf32>
    %36 = arith.negf %35 : vector<2x32xf32>
    %37 = math.exp %36 : vector<2x32xf32>
    %cst_15 = arith.constant 1.000000e+00 : f32
    %38 = vector.broadcast %cst_15 : f32 to vector<2x32xf32>
    %39 = arith.addf %38, %37 : vector<2x32xf32>
    %40 = arith.divf %38, %39 : vector<2x32xf32>
    %41 = arith.mulf %32, %16 : vector<2x32xf32>
    %42 = arith.mulf %26, %34 : vector<2x32xf32>
    %43 = arith.addf %41, %42 : vector<2x32xf32>
    %44 = math.tanh %43 : vector<2x32xf32>
    %45 = arith.mulf %40, %44 : vector<2x32xf32>
    %46 = vector.extract_strided_slice %13 {offsets = [0, 0], sizes = [2, 1], strides = [1, 1]} : vector<2x8xf32> to vector<2x1xf32>
    %47 = vector.broadcast %46 : vector<2x1xf32> to vector<2x32xf32>
    %48 = arith.mulf %47, %45 : vector<2x32xf32>
    %cst_16 = arith.constant 1.000000e+00 : f32
    %49 = vector.broadcast %cst_16 : f32 to vector<2x1xf32>
    %50 = arith.subf %49, %46 : vector<2x1xf32>
    %51 = vector.broadcast %50 : vector<2x1xf32> to vector<2x32xf32>
    %52 = arith.mulf %51, %15 : vector<2x32xf32>
    %53 = arith.addf %48, %52 : vector<2x32xf32>
    %54 = vector.broadcast %46 : vector<2x1xf32> to vector<2x32xf32>
    %55 = arith.mulf %54, %43 : vector<2x32xf32>
    %cst_17 = arith.constant 1.000000e+00 : f32
    %56 = vector.broadcast %cst_17 : f32 to vector<2x1xf32>
    %57 = arith.subf %56, %46 : vector<2x1xf32>
    %58 = vector.broadcast %57 : vector<2x1xf32> to vector<2x32xf32>
    %59 = arith.mulf %58, %16 : vector<2x32xf32>
    %60 = arith.addf %55, %59 : vector<2x32xf32>
    %61 = vector.broadcast %46 : vector<2x1xf32> to vector<2x32xf32>
    %62 = arith.mulf %61, %45 : vector<2x32xf32>
    %63 = vector.shape_cast %62 : vector<2x32xf32> to vector<2x1x32xf32>
    %c0_18 = arith.constant 0 : index
    %c0_19 = arith.constant 0 : index
    %c0_20 = arith.constant 0 : index
    %64 = vector.load %arg8[%c0_18, %c0_19, %c0_20] : memref<2x8x32xf32, #tpu.memory_space<vmem>>, vector<2x1x32xf32>
    tpu.vector_store %arg8[%c0_18, %c0_19, %c0_20], %63 {strides = array<i32>} : memref<2x8x32xf32, #tpu.memory_space<vmem>>, vector<2x1x32xf32>,
    %65 = vector.extract_strided_slice %7 {offsets = [0, 1, 0], sizes = [2, 1, 128], strides = [1, 1, 1]} : vector<2x8x128xf32> to vector<2x1x128xf32>
    %66 = vector.shape_cast %65 : vector<2x1x128xf32> to vector<2x128xf32>
    %cst_21 = arith.constant dense<0.000000e+00> : vector<2x128xf32>
    %67 = tpu.matmul %53, %14, %cst_21 {dimension_numbers = #tpu.dot_dimension_numbers<[1], [0], [0], [1], [0, 0, 1, 1], [], []>} : vector<2x32xf32>, vector<32x128xf32>, vector<2x128xf32> -> vector<2x128xf32>
    %68 = arith.addf %66, %67 : vector<2x128xf32>
    %69 = vector.extract_strided_slice %68 {offsets = [0, 0], sizes = [2, 32], strides = [1, 1]} : vector<2x128xf32> to vector<2x32xf32>
    %70 = arith.negf %69 : vector<2x32xf32>
    %71 = math.exp %70 : vector<2x32xf32>
    %cst_22 = arith.constant 1.000000e+00 : f32
    %72 = vector.broadcast %cst_22 : f32 to vector<2x32xf32>
    %73 = arith.addf %72, %71 : vector<2x32xf32>
    %74 = arith.divf %72, %73 : vector<2x32xf32>
    %75 = vector.extract_strided_slice %68 {offsets = [0, 32], sizes = [2, 32], strides = [1, 1]} : vector<2x128xf32> to vector<2x32xf32>
    %76 = arith.negf %75 : vector<2x32xf32>
    %77 = math.exp %76 : vector<2x32xf32>
    %cst_23 = arith.constant 1.000000e+00 : f32
    %78 = vector.broadcast %cst_23 : f32 to vector<2x32xf32>
    %79 = arith.addf %78, %77 : vector<2x32xf32>
    %80 = arith.divf %78, %79 : vector<2x32xf32>
    %81 = vector.extract_strided_slice %68 {offsets = [0, 64], sizes = [2, 32], strides = [1, 1]} : vector<2x128xf32> to vector<2x32xf32>
    %82 = math.tanh %81 : vector<2x32xf32>
    %83 = vector.extract_strided_slice %68 {offsets = [0, 96], sizes = [2, 32], strides = [1, 1]} : vector<2x128xf32> to vector<2x32xf32>
    %84 = arith.negf %83 : vector<2x32xf32>
    %85 = math.exp %84 : vector<2x32xf32>
    %cst_24 = arith.constant 1.000000e+00 : f32
    %86 = vector.broadcast %cst_24 : f32 to vector<2x32xf32>
    %87 = arith.addf %86, %85 : vector<2x32xf32>
    %88 = arith.divf %86, %87 : vector<2x32xf32>
    %89 = arith.mulf %80, %60 : vector<2x32xf32>
    %90 = arith.mulf %74, %82 : vector<2x32xf32>
    %91 = arith.addf %89, %90 : vector<2x32xf32>
    %92 = math.tanh %91 : vector<2x32xf32>
    %93 = arith.mulf %88, %92 : vector<2x32xf32>
    %94 = vector.extract_strided_slice %13 {offsets = [0, 1], sizes = [2, 1], strides = [1, 1]} : vector<2x8xf32> to vector<2x1xf32>
    %95 = vector.broadcast %94 : vector<2x1xf32> to vector<2x32xf32>
    %96 = arith.mulf %95, %93 : vector<2x32xf32>
    %cst_25 = arith.constant 1.000000e+00 : f32
    %97 = vector.broadcast %cst_25 : f32 to vector<2x1xf32>
    %98 = arith.subf %97, %94 : vector<2x1xf32>
    %99 = vector.broadcast %98 : vector<2x1xf32> to vector<2x32xf32>
    %100 = arith.mulf %99, %53 : vector<2x32xf32>
    %101 = arith.addf %96, %100 : vector<2x32xf32>
    %102 = vector.broadcast %94 : vector<2x1xf32> to vector<2x32xf32>
    %103 = arith.mulf %102, %91 : vector<2x32xf32>
    %cst_26 = arith.constant 1.000000e+00 : f32
    %104 = vector.broadcast %cst_26 : f32 to vector<2x1xf32>
    %105 = arith.subf %104, %94 : vector<2x1xf32>
    %106 = vector.broadcast %105 : vector<2x1xf32> to vector<2x32xf32>
    %107 = arith.mulf %106, %60 : vector<2x32xf32>
    %108 = arith.addf %103, %107 : vector<2x32xf32>
    %109 = vector.broadcast %94 : vector<2x1xf32> to vector<2x32xf32>
    %110 = arith.mulf %109, %93 : vector<2x32xf32>
    %111 = vector.shape_cast %110 : vector<2x32xf32> to vector<2x1x32xf32>
    %c0_27 = arith.constant 0 : index
    %c1 = arith.constant 1 : index
    %c0_28 = arith.constant 0 : index
    %112 = vector.load %arg8[%c0_27, %c1, %c0_28] : memref<2x8x32xf32, #tpu.memory_space<vmem>>, vector<2x1x32xf32>
    tpu.vector_store %arg8[%c0_27, %c1, %c0_28], %111 {strides = array<i32>} : memref<2x8x32xf32, #tpu.memory_space<vmem>>, vector<2x1x32xf32>,
    %113 = vector.extract_strided_slice %7 {offsets = [0, 2, 0], sizes = [2, 1, 128], strides = [1, 1, 1]} : vector<2x8x128xf32> to vector<2x1x128xf32>
    %114 = vector.shape_cast %113 : vector<2x1x128xf32> to vector<2x128xf32>
    %cst_29 = arith.constant dense<0.000000e+00> : vector<2x128xf32>
    %115 = tpu.matmul %101, %14, %cst_29 {dimension_numbers = #tpu.dot_dimension_numbers<[1], [0], [0], [1], [0, 0, 1, 1], [], []>} : vector<2x32xf32>, vector<32x128xf32>, vector<2x128xf32> -> vector<2x128xf32>
    %116 = arith.addf %114, %115 : vector<2x128xf32>
    %117 = vector.extract_strided_slice %116 {offsets = [0, 0], sizes = [2, 32], strides = [1, 1]} : vector<2x128xf32> to vector<2x32xf32>
    %118 = arith.negf %117 : vector<2x32xf32>
    %119 = math.exp %118 : vector<2x32xf32>
    %cst_30 = arith.constant 1.000000e+00 : f32
    %120 = vector.broadcast %cst_30 : f32 to vector<2x32xf32>
    %121 = arith.addf %120, %119 : vector<2x32xf32>
    %122 = arith.divf %120, %121 : vector<2x32xf32>
    %123 = vector.extract_strided_slice %116 {offsets = [0, 32], sizes = [2, 32], strides = [1, 1]} : vector<2x128xf32> to vector<2x32xf32>
    %124 = arith.negf %123 : vector<2x32xf32>
    %125 = math.exp %124 : vector<2x32xf32>
    %cst_31 = arith.constant 1.000000e+00 : f32
    %126 = vector.broadcast %cst_31 : f32 to vector<2x32xf32>
    %127 = arith.addf %126, %125 : vector<2x32xf32>
    %128 = arith.divf %126, %127 : vector<2x32xf32>
    %129 = vector.extract_strided_slice %116 {offsets = [0, 64], sizes = [2, 32], strides = [1, 1]} : vector<2x128xf32> to vector<2x32xf32>
    %130 = math.tanh %129 : vector<2x32xf32>
    %131 = vector.extract_strided_slice %116 {offsets = [0, 96], sizes = [2, 32], strides = [1, 1]} : vector<2x128xf32> to vector<2x32xf32>
    %132 = arith.negf %131 : vector<2x32xf32>
    %133 = math.exp %132 : vector<2x32xf32>
    %cst_32 = arith.constant 1.000000e+00 : f32
    %134 = vector.broadcast %cst_32 : f32 to vector<2x32xf32>
    %135 = arith.addf %134, %133 : vector<2x32xf32>
    %136 = arith.divf %134, %135 : vector<2x32xf32>
    %137 = arith.mulf %128, %108 : vector<2x32xf32>
    %138 = arith.mulf %122, %130 : vector<2x32xf32>
    %139 = arith.addf %137, %138 : vector<2x32xf32>
    %140 = math.tanh %139 : vector<2x32xf32>
    %141 = arith.mulf %136, %140 : vector<2x32xf32>
    %142 = vector.extract_strided_slice %13 {offsets = [0, 2], sizes = [2, 1], strides = [1, 1]} : vector<2x8xf32> to vector<2x1xf32>
    %143 = vector.broadcast %142 : vector<2x1xf32> to vector<2x32xf32>
    %144 = arith.mulf %143, %141 : vector<2x32xf32>
    %cst_33 = arith.constant 1.000000e+00 : f32
    %145 = vector.broadcast %cst_33 : f32 to vector<2x1xf32>
    %146 = arith.subf %145, %142 : vector<2x1xf32>
    %147 = vector.broadcast %146 : vector<2x1xf32> to vector<2x32xf32>
    %148 = arith.mulf %147, %101 : vector<2x32xf32>
    %149 = arith.addf %144, %148 : vector<2x32xf32>
    %150 = vector.broadcast %142 : vector<2x1xf32> to vector<2x32xf32>
    %151 = arith.mulf %150, %139 : vector<2x32xf32>
    %cst_34 = arith.constant 1.000000e+00 : f32
    %152 = vector.broadcast %cst_34 : f32 to vector<2x1xf32>
    %153 = arith.subf %152, %142 : vector<2x1xf32>
    %154 = vector.broadcast %153 : vector<2x1xf32> to vector<2x32xf32>
    %155 = arith.mulf %154, %108 : vector<2x32xf32>
    %156 = arith.addf %151, %155 : vector<2x32xf32>
    %157 = vector.broadcast %142 : vector<2x1xf32> to vector<2x32xf32>
    %158 = arith.mulf %157, %141 : vector<2x32xf32>
    %159 = vector.shape_cast %158 : vector<2x32xf32> to vector<2x1x32xf32>
    %c0_35 = arith.constant 0 : index
    %c2 = arith.constant 2 : index
    %c0_36 = arith.constant 0 : index
    %160 = vector.load %arg8[%c0_35, %c2, %c0_36] : memref<2x8x32xf32, #tpu.memory_space<vmem>>, vector<2x1x32xf32>
    tpu.vector_store %arg8[%c0_35, %c2, %c0_36], %159 {strides = array<i32>} : memref<2x8x32xf32, #tpu.memory_space<vmem>>, vector<2x1x32xf32>,
    %161 = vector.extract_strided_slice %7 {offsets = [0, 3, 0], sizes = [2, 1, 128], strides = [1, 1, 1]} : vector<2x8x128xf32> to vector<2x1x128xf32>
    %162 = vector.shape_cast %161 : vector<2x1x128xf32> to vector<2x128xf32>
    %cst_37 = arith.constant dense<0.000000e+00> : vector<2x128xf32>
    %163 = tpu.matmul %149, %14, %cst_37 {dimension_numbers = #tpu.dot_dimension_numbers<[1], [0], [0], [1], [0, 0, 1, 1], [], []>} : vector<2x32xf32>, vector<32x128xf32>, vector<2x128xf32> -> vector<2x128xf32>
    %164 = arith.addf %162, %163 : vector<2x128xf32>
    %165 = vector.extract_strided_slice %164 {offsets = [0, 0], sizes = [2, 32], strides = [1, 1]} : vector<2x128xf32> to vector<2x32xf32>
    %166 = arith.negf %165 : vector<2x32xf32>
    %167 = math.exp %166 : vector<2x32xf32>
    %cst_38 = arith.constant 1.000000e+00 : f32
    %168 = vector.broadcast %cst_38 : f32 to vector<2x32xf32>
    %169 = arith.addf %168, %167 : vector<2x32xf32>
    %170 = arith.divf %168, %169 : vector<2x32xf32>
    %171 = vector.extract_strided_slice %164 {offsets = [0, 32], sizes = [2, 32], strides = [1, 1]} : vector<2x128xf32> to vector<2x32xf32>
    %172 = arith.negf %171 : vector<2x32xf32>
    %173 = math.exp %172 : vector<2x32xf32>
    %cst_39 = arith.constant 1.000000e+00 : f32
    %174 = vector.broadcast %cst_39 : f32 to vector<2x32xf32>
    %175 = arith.addf %174, %173 : vector<2x32xf32>
    %176 = arith.divf %174, %175 : vector<2x32xf32>
    %177 = vector.extract_strided_slice %164 {offsets = [0, 64], sizes = [2, 32], strides = [1, 1]} : vector<2x128xf32> to vector<2x32xf32>
    %178 = math.tanh %177 : vector<2x32xf32>
    %179 = vector.extract_strided_slice %164 {offsets = [0, 96], sizes = [2, 32], strides = [1, 1]} : vector<2x128xf32> to vector<2x32xf32>
    %180 = arith.negf %179 : vector<2x32xf32>
    %181 = math.exp %180 : vector<2x32xf32>
    %cst_40 = arith.constant 1.000000e+00 : f32
    %182 = vector.broadcast %cst_40 : f32 to vector<2x32xf32>
    %183 = arith.addf %182, %181 : vector<2x32xf32>
    %184 = arith.divf %182, %183 : vector<2x32xf32>
    %185 = arith.mulf %176, %156 : vector<2x32xf32>
    %186 = arith.mulf %170, %178 : vector<2x32xf32>
    %187 = arith.addf %185, %186 : vector<2x32xf32>
    %188 = math.tanh %187 : vector<2x32xf32>
    %189 = arith.mulf %184, %188 : vector<2x32xf32>
    %190 = vector.extract_strided_slice %13 {offsets = [0, 3], sizes = [2, 1], strides = [1, 1]} : vector<2x8xf32> to vector<2x1xf32>
    %191 = vector.broadcast %190 : vector<2x1xf32> to vector<2x32xf32>
    %192 = arith.mulf %191, %189 : vector<2x32xf32>
    %cst_41 = arith.constant 1.000000e+00 : f32
    %193 = vector.broadcast %cst_41 : f32 to vector<2x1xf32>
    %194 = arith.subf %193, %190 : vector<2x1xf32>
    %195 = vector.broadcast %194 : vector<2x1xf32> to vector<2x32xf32>
    %196 = arith.mulf %195, %149 : vector<2x32xf32>
    %197 = arith.addf %192, %196 : vector<2x32xf32>
    %198 = vector.broadcast %190 : vector<2x1xf32> to vector<2x32xf32>
    %199 = arith.mulf %198, %187 : vector<2x32xf32>
    %cst_42 = arith.constant 1.000000e+00 : f32
    %200 = vector.broadcast %cst_42 : f32 to vector<2x1xf32>
    %201 = arith.subf %200, %190 : vector<2x1xf32>
    %202 = vector.broadcast %201 : vector<2x1xf32> to vector<2x32xf32>
    %203 = arith.mulf %202, %156 : vector<2x32xf32>
    %204 = arith.addf %199, %203 : vector<2x32xf32>
    %205 = vector.broadcast %190 : vector<2x1xf32> to vector<2x32xf32>
    %206 = arith.mulf %205, %189 : vector<2x32xf32>
    %207 = vector.shape_cast %206 : vector<2x32xf32> to vector<2x1x32xf32>
    %c0_43 = arith.constant 0 : index
    %c3 = arith.constant 3 : index
    %c0_44 = arith.constant 0 : index
    %208 = vector.load %arg8[%c0_43, %c3, %c0_44] : memref<2x8x32xf32, #tpu.memory_space<vmem>>, vector<2x1x32xf32>
    tpu.vector_store %arg8[%c0_43, %c3, %c0_44], %207 {strides = array<i32>} : memref<2x8x32xf32, #tpu.memory_space<vmem>>, vector<2x1x32xf32>,
    %209 = vector.extract_strided_slice %7 {offsets = [0, 4, 0], sizes = [2, 1, 128], strides = [1, 1, 1]} : vector<2x8x128xf32> to vector<2x1x128xf32>
    %210 = vector.shape_cast %209 : vector<2x1x128xf32> to vector<2x128xf32>
    %cst_45 = arith.constant dense<0.000000e+00> : vector<2x128xf32>
    %211 = tpu.matmul %197, %14, %cst_45 {dimension_numbers = #tpu.dot_dimension_numbers<[1], [0], [0], [1], [0, 0, 1, 1], [], []>} : vector<2x32xf32>, vector<32x128xf32>, vector<2x128xf32> -> vector<2x128xf32>
    %212 = arith.addf %210, %211 : vector<2x128xf32>
    %213 = vector.extract_strided_slice %212 {offsets = [0, 0], sizes = [2, 32], strides = [1, 1]} : vector<2x128xf32> to vector<2x32xf32>
    %214 = arith.negf %213 : vector<2x32xf32>
    %215 = math.exp %214 : vector<2x32xf32>
    %cst_46 = arith.constant 1.000000e+00 : f32
    %216 = vector.broadcast %cst_46 : f32 to vector<2x32xf32>
    %217 = arith.addf %216, %215 : vector<2x32xf32>
    %218 = arith.divf %216, %217 : vector<2x32xf32>
    %219 = vector.extract_strided_slice %212 {offsets = [0, 32], sizes = [2, 32], strides = [1, 1]} : vector<2x128xf32> to vector<2x32xf32>
    %220 = arith.negf %219 : vector<2x32xf32>
    %221 = math.exp %220 : vector<2x32xf32>
    %cst_47 = arith.constant 1.000000e+00 : f32
    %222 = vector.broadcast %cst_47 : f32 to vector<2x32xf32>
    %223 = arith.addf %222, %221 : vector<2x32xf32>
    %224 = arith.divf %222, %223 : vector<2x32xf32>
    %225 = vector.extract_strided_slice %212 {offsets = [0, 64], sizes = [2, 32], strides = [1, 1]} : vector<2x128xf32> to vector<2x32xf32>
    %226 = math.tanh %225 : vector<2x32xf32>
    %227 = vector.extract_strided_slice %212 {offsets = [0, 96], sizes = [2, 32], strides = [1, 1]} : vector<2x128xf32> to vector<2x32xf32>
    %228 = arith.negf %227 : vector<2x32xf32>
    %229 = math.exp %228 : vector<2x32xf32>
    %cst_48 = arith.constant 1.000000e+00 : f32
    %230 = vector.broadcast %cst_48 : f32 to vector<2x32xf32>
    %231 = arith.addf %230, %229 : vector<2x32xf32>
    %232 = arith.divf %230, %231 : vector<2x32xf32>
    %233 = arith.mulf %224, %204 : vector<2x32xf32>
    %234 = arith.mulf %218, %226 : vector<2x32xf32>
    %235 = arith.addf %233, %234 : vector<2x32xf32>
    %236 = math.tanh %235 : vector<2x32xf32>
    %237 = arith.mulf %232, %236 : vector<2x32xf32>
    %238 = vector.extract_strided_slice %13 {offsets = [0, 4], sizes = [2, 1], strides = [1, 1]} : vector<2x8xf32> to vector<2x1xf32>
    %239 = vector.broadcast %238 : vector<2x1xf32> to vector<2x32xf32>
    %240 = arith.mulf %239, %237 : vector<2x32xf32>
    %cst_49 = arith.constant 1.000000e+00 : f32
    %241 = vector.broadcast %cst_49 : f32 to vector<2x1xf32>
    %242 = arith.subf %241, %238 : vector<2x1xf32>
    %243 = vector.broadcast %242 : vector<2x1xf32> to vector<2x32xf32>
    %244 = arith.mulf %243, %197 : vector<2x32xf32>
    %245 = arith.addf %240, %244 : vector<2x32xf32>
    %246 = vector.broadcast %238 : vector<2x1xf32> to vector<2x32xf32>
    %247 = arith.mulf %246, %235 : vector<2x32xf32>
    %cst_50 = arith.constant 1.000000e+00 : f32
    %248 = vector.broadcast %cst_50 : f32 to vector<2x1xf32>
    %249 = arith.subf %248, %238 : vector<2x1xf32>
    %250 = vector.broadcast %249 : vector<2x1xf32> to vector<2x32xf32>
    %251 = arith.mulf %250, %204 : vector<2x32xf32>
    %252 = arith.addf %247, %251 : vector<2x32xf32>
    %253 = vector.broadcast %238 : vector<2x1xf32> to vector<2x32xf32>
    %254 = arith.mulf %253, %237 : vector<2x32xf32>
    %255 = vector.shape_cast %254 : vector<2x32xf32> to vector<2x1x32xf32>
    %c0_51 = arith.constant 0 : index
    %c4 = arith.constant 4 : index
    %c0_52 = arith.constant 0 : index
    %256 = vector.load %arg8[%c0_51, %c4, %c0_52] : memref<2x8x32xf32, #tpu.memory_space<vmem>>, vector<2x1x32xf32>
    tpu.vector_store %arg8[%c0_51, %c4, %c0_52], %255 {strides = array<i32>} : memref<2x8x32xf32, #tpu.memory_space<vmem>>, vector<2x1x32xf32>,
    %257 = vector.extract_strided_slice %7 {offsets = [0, 5, 0], sizes = [2, 1, 128], strides = [1, 1, 1]} : vector<2x8x128xf32> to vector<2x1x128xf32>
    %258 = vector.shape_cast %257 : vector<2x1x128xf32> to vector<2x128xf32>
    %cst_53 = arith.constant dense<0.000000e+00> : vector<2x128xf32>
    %259 = tpu.matmul %245, %14, %cst_53 {dimension_numbers = #tpu.dot_dimension_numbers<[1], [0], [0], [1], [0, 0, 1, 1], [], []>} : vector<2x32xf32>, vector<32x128xf32>, vector<2x128xf32> -> vector<2x128xf32>
    %260 = arith.addf %258, %259 : vector<2x128xf32>
    %261 = vector.extract_strided_slice %260 {offsets = [0, 0], sizes = [2, 32], strides = [1, 1]} : vector<2x128xf32> to vector<2x32xf32>
    %262 = arith.negf %261 : vector<2x32xf32>
    %263 = math.exp %262 : vector<2x32xf32>
    %cst_54 = arith.constant 1.000000e+00 : f32
    %264 = vector.broadcast %cst_54 : f32 to vector<2x32xf32>
    %265 = arith.addf %264, %263 : vector<2x32xf32>
    %266 = arith.divf %264, %265 : vector<2x32xf32>
    %267 = vector.extract_strided_slice %260 {offsets = [0, 32], sizes = [2, 32], strides = [1, 1]} : vector<2x128xf32> to vector<2x32xf32>
    %268 = arith.negf %267 : vector<2x32xf32>
    %269 = math.exp %268 : vector<2x32xf32>
    %cst_55 = arith.constant 1.000000e+00 : f32
    %270 = vector.broadcast %cst_55 : f32 to vector<2x32xf32>
    %271 = arith.addf %270, %269 : vector<2x32xf32>
    %272 = arith.divf %270, %271 : vector<2x32xf32>
    %273 = vector.extract_strided_slice %260 {offsets = [0, 64], sizes = [2, 32], strides = [1, 1]} : vector<2x128xf32> to vector<2x32xf32>
    %274 = math.tanh %273 : vector<2x32xf32>
    %275 = vector.extract_strided_slice %260 {offsets = [0, 96], sizes = [2, 32], strides = [1, 1]} : vector<2x128xf32> to vector<2x32xf32>
    %276 = arith.negf %275 : vector<2x32xf32>
    %277 = math.exp %276 : vector<2x32xf32>
    %cst_56 = arith.constant 1.000000e+00 : f32
    %278 = vector.broadcast %cst_56 : f32 to vector<2x32xf32>
    %279 = arith.addf %278, %277 : vector<2x32xf32>
    %280 = arith.divf %278, %279 : vector<2x32xf32>
    %281 = arith.mulf %272, %252 : vector<2x32xf32>
    %282 = arith.mulf %266, %274 : vector<2x32xf32>
    %283 = arith.addf %281, %282 : vector<2x32xf32>
    %284 = math.tanh %283 : vector<2x32xf32>
    %285 = arith.mulf %280, %284 : vector<2x32xf32>
    %286 = vector.extract_strided_slice %13 {offsets = [0, 5], sizes = [2, 1], strides = [1, 1]} : vector<2x8xf32> to vector<2x1xf32>
    %287 = vector.broadcast %286 : vector<2x1xf32> to vector<2x32xf32>
    %288 = arith.mulf %287, %285 : vector<2x32xf32>
    %cst_57 = arith.constant 1.000000e+00 : f32
    %289 = vector.broadcast %cst_57 : f32 to vector<2x1xf32>
    %290 = arith.subf %289, %286 : vector<2x1xf32>
    %291 = vector.broadcast %290 : vector<2x1xf32> to vector<2x32xf32>
    %292 = arith.mulf %291, %245 : vector<2x32xf32>
    %293 = arith.addf %288, %292 : vector<2x32xf32>
    %294 = vector.broadcast %286 : vector<2x1xf32> to vector<2x32xf32>
    %295 = arith.mulf %294, %283 : vector<2x32xf32>
    %cst_58 = arith.constant 1.000000e+00 : f32
    %296 = vector.broadcast %cst_58 : f32 to vector<2x1xf32>
    %297 = arith.subf %296, %286 : vector<2x1xf32>
    %298 = vector.broadcast %297 : vector<2x1xf32> to vector<2x32xf32>
    %299 = arith.mulf %298, %252 : vector<2x32xf32>
    %300 = arith.addf %295, %299 : vector<2x32xf32>
    %301 = vector.broadcast %286 : vector<2x1xf32> to vector<2x32xf32>
    %302 = arith.mulf %301, %285 : vector<2x32xf32>
    %303 = vector.shape_cast %302 : vector<2x32xf32> to vector<2x1x32xf32>
    %c0_59 = arith.constant 0 : index
    %c5 = arith.constant 5 : index
    %c0_60 = arith.constant 0 : index
    %304 = vector.load %arg8[%c0_59, %c5, %c0_60] : memref<2x8x32xf32, #tpu.memory_space<vmem>>, vector<2x1x32xf32>
    tpu.vector_store %arg8[%c0_59, %c5, %c0_60], %303 {strides = array<i32>} : memref<2x8x32xf32, #tpu.memory_space<vmem>>, vector<2x1x32xf32>,
    %305 = vector.extract_strided_slice %7 {offsets = [0, 6, 0], sizes = [2, 1, 128], strides = [1, 1, 1]} : vector<2x8x128xf32> to vector<2x1x128xf32>
    %306 = vector.shape_cast %305 : vector<2x1x128xf32> to vector<2x128xf32>
    %cst_61 = arith.constant dense<0.000000e+00> : vector<2x128xf32>
    %307 = tpu.matmul %293, %14, %cst_61 {dimension_numbers = #tpu.dot_dimension_numbers<[1], [0], [0], [1], [0, 0, 1, 1], [], []>} : vector<2x32xf32>, vector<32x128xf32>, vector<2x128xf32> -> vector<2x128xf32>
    %308 = arith.addf %306, %307 : vector<2x128xf32>
    %309 = vector.extract_strided_slice %308 {offsets = [0, 0], sizes = [2, 32], strides = [1, 1]} : vector<2x128xf32> to vector<2x32xf32>
    %310 = arith.negf %309 : vector<2x32xf32>
    %311 = math.exp %310 : vector<2x32xf32>
    %cst_62 = arith.constant 1.000000e+00 : f32
    %312 = vector.broadcast %cst_62 : f32 to vector<2x32xf32>
    %313 = arith.addf %312, %311 : vector<2x32xf32>
    %314 = arith.divf %312, %313 : vector<2x32xf32>
    %315 = vector.extract_strided_slice %308 {offsets = [0, 32], sizes = [2, 32], strides = [1, 1]} : vector<2x128xf32> to vector<2x32xf32>
    %316 = arith.negf %315 : vector<2x32xf32>
    %317 = math.exp %316 : vector<2x32xf32>
    %cst_63 = arith.constant 1.000000e+00 : f32
    %318 = vector.broadcast %cst_63 : f32 to vector<2x32xf32>
    %319 = arith.addf %318, %317 : vector<2x32xf32>
    %320 = arith.divf %318, %319 : vector<2x32xf32>
    %321 = vector.extract_strided_slice %308 {offsets = [0, 64], sizes = [2, 32], strides = [1, 1]} : vector<2x128xf32> to vector<2x32xf32>
    %322 = math.tanh %321 : vector<2x32xf32>
    %323 = vector.extract_strided_slice %308 {offsets = [0, 96], sizes = [2, 32], strides = [1, 1]} : vector<2x128xf32> to vector<2x32xf32>
    %324 = arith.negf %323 : vector<2x32xf32>
    %325 = math.exp %324 : vector<2x32xf32>
    %cst_64 = arith.constant 1.000000e+00 : f32
    %326 = vector.broadcast %cst_64 : f32 to vector<2x32xf32>
    %327 = arith.addf %326, %325 : vector<2x32xf32>
    %328 = arith.divf %326, %327 : vector<2x32xf32>
    %329 = arith.mulf %320, %300 : vector<2x32xf32>
    %330 = arith.mulf %314, %322 : vector<2x32xf32>
    %331 = arith.addf %329, %330 : vector<2x32xf32>
    %332 = math.tanh %331 : vector<2x32xf32>
    %333 = arith.mulf %328, %332 : vector<2x32xf32>
    %334 = vector.extract_strided_slice %13 {offsets = [0, 6], sizes = [2, 1], strides = [1, 1]} : vector<2x8xf32> to vector<2x1xf32>
    %335 = vector.broadcast %334 : vector<2x1xf32> to vector<2x32xf32>
    %336 = arith.mulf %335, %333 : vector<2x32xf32>
    %cst_65 = arith.constant 1.000000e+00 : f32
    %337 = vector.broadcast %cst_65 : f32 to vector<2x1xf32>
    %338 = arith.subf %337, %334 : vector<2x1xf32>
    %339 = vector.broadcast %338 : vector<2x1xf32> to vector<2x32xf32>
    %340 = arith.mulf %339, %293 : vector<2x32xf32>
    %341 = arith.addf %336, %340 : vector<2x32xf32>
    %342 = vector.broadcast %334 : vector<2x1xf32> to vector<2x32xf32>
    %343 = arith.mulf %342, %331 : vector<2x32xf32>
    %cst_66 = arith.constant 1.000000e+00 : f32
    %344 = vector.broadcast %cst_66 : f32 to vector<2x1xf32>
    %345 = arith.subf %344, %334 : vector<2x1xf32>
    %346 = vector.broadcast %345 : vector<2x1xf32> to vector<2x32xf32>
    %347 = arith.mulf %346, %300 : vector<2x32xf32>
    %348 = arith.addf %343, %347 : vector<2x32xf32>
    %349 = vector.broadcast %334 : vector<2x1xf32> to vector<2x32xf32>
    %350 = arith.mulf %349, %333 : vector<2x32xf32>
    %351 = vector.shape_cast %350 : vector<2x32xf32> to vector<2x1x32xf32>
    %c0_67 = arith.constant 0 : index
    %c6 = arith.constant 6 : index
    %c0_68 = arith.constant 0 : index
    %352 = vector.load %arg8[%c0_67, %c6, %c0_68] : memref<2x8x32xf32, #tpu.memory_space<vmem>>, vector<2x1x32xf32>
    tpu.vector_store %arg8[%c0_67, %c6, %c0_68], %351 {strides = array<i32>} : memref<2x8x32xf32, #tpu.memory_space<vmem>>, vector<2x1x32xf32>,
    %353 = vector.extract_strided_slice %7 {offsets = [0, 7, 0], sizes = [2, 1, 128], strides = [1, 1, 1]} : vector<2x8x128xf32> to vector<2x1x128xf32>
    %354 = vector.shape_cast %353 : vector<2x1x128xf32> to vector<2x128xf32>
    %cst_69 = arith.constant dense<0.000000e+00> : vector<2x128xf32>
    %355 = tpu.matmul %341, %14, %cst_69 {dimension_numbers = #tpu.dot_dimension_numbers<[1], [0], [0], [1], [0, 0, 1, 1], [], []>} : vector<2x32xf32>, vector<32x128xf32>, vector<2x128xf32> -> vector<2x128xf32>
    %356 = arith.addf %354, %355 : vector<2x128xf32>
    %357 = vector.extract_strided_slice %356 {offsets = [0, 0], sizes = [2, 32], strides = [1, 1]} : vector<2x128xf32> to vector<2x32xf32>
    %358 = arith.negf %357 : vector<2x32xf32>
    %359 = math.exp %358 : vector<2x32xf32>
    %cst_70 = arith.constant 1.000000e+00 : f32
    %360 = vector.broadcast %cst_70 : f32 to vector<2x32xf32>
    %361 = arith.addf %360, %359 : vector<2x32xf32>
    %362 = arith.divf %360, %361 : vector<2x32xf32>
    %363 = vector.extract_strided_slice %356 {offsets = [0, 32], sizes = [2, 32], strides = [1, 1]} : vector<2x128xf32> to vector<2x32xf32>
    %364 = arith.negf %363 : vector<2x32xf32>
    %365 = math.exp %364 : vector<2x32xf32>
    %cst_71 = arith.constant 1.000000e+00 : f32
    %366 = vector.broadcast %cst_71 : f32 to vector<2x32xf32>
    %367 = arith.addf %366, %365 : vector<2x32xf32>
    %368 = arith.divf %366, %367 : vector<2x32xf32>
    %369 = vector.extract_strided_slice %356 {offsets = [0, 64], sizes = [2, 32], strides = [1, 1]} : vector<2x128xf32> to vector<2x32xf32>
    %370 = math.tanh %369 : vector<2x32xf32>
    %371 = vector.extract_strided_slice %356 {offsets = [0, 96], sizes = [2, 32], strides = [1, 1]} : vector<2x128xf32> to vector<2x32xf32>
    %372 = arith.negf %371 : vector<2x32xf32>
    %373 = math.exp %372 : vector<2x32xf32>
    %cst_72 = arith.constant 1.000000e+00 : f32
    %374 = vector.broadcast %cst_72 : f32 to vector<2x32xf32>
    %375 = arith.addf %374, %373 : vector<2x32xf32>
    %376 = arith.divf %374, %375 : vector<2x32xf32>
    %377 = arith.mulf %368, %348 : vector<2x32xf32>
    %378 = arith.mulf %362, %370 : vector<2x32xf32>
    %379 = arith.addf %377, %378 : vector<2x32xf32>
    %380 = math.tanh %379 : vector<2x32xf32>
    %381 = arith.mulf %376, %380 : vector<2x32xf32>
    %382 = vector.extract_strided_slice %13 {offsets = [0, 7], sizes = [2, 1], strides = [1, 1]} : vector<2x8xf32> to vector<2x1xf32>
    %383 = vector.broadcast %382 : vector<2x1xf32> to vector<2x32xf32>
    %384 = arith.mulf %383, %381 : vector<2x32xf32>
    %cst_73 = arith.constant 1.000000e+00 : f32
    %385 = vector.broadcast %cst_73 : f32 to vector<2x1xf32>
    %386 = arith.subf %385, %382 : vector<2x1xf32>
    %387 = vector.broadcast %386 : vector<2x1xf32> to vector<2x32xf32>
    %388 = arith.mulf %387, %341 : vector<2x32xf32>
    %389 = arith.addf %384, %388 : vector<2x32xf32>
    %390 = vector.broadcast %382 : vector<2x1xf32> to vector<2x32xf32>
    %391 = arith.mulf %390, %379 : vector<2x32xf32>
    %cst_74 = arith.constant 1.000000e+00 : f32
    %392 = vector.broadcast %cst_74 : f32 to vector<2x1xf32>
    %393 = arith.subf %392, %382 : vector<2x1xf32>
    %394 = vector.broadcast %393 : vector<2x1xf32> to vector<2x32xf32>
    %395 = arith.mulf %394, %348 : vector<2x32xf32>
    %396 = arith.addf %391, %395 : vector<2x32xf32>
    %397 = vector.broadcast %382 : vector<2x1xf32> to vector<2x32xf32>
    %398 = arith.mulf %397, %381 : vector<2x32xf32>
    %399 = vector.shape_cast %398 : vector<2x32xf32> to vector<2x1x32xf32>
    %c0_75 = arith.constant 0 : index
    %c7 = arith.constant 7 : index
    %c0_76 = arith.constant 0 : index
    %400 = vector.load %arg8[%c0_75, %c7, %c0_76] : memref<2x8x32xf32, #tpu.memory_space<vmem>>, vector<2x1x32xf32>
    tpu.vector_store %arg8[%c0_75, %c7, %c0_76], %399 {strides = array<i32>} : memref<2x8x32xf32, #tpu.memory_space<vmem>>, vector<2x1x32xf32>,
    %c0_77 = arith.constant 0 : index
    %c0_78 = arith.constant 0 : index
    %401 = vector.load %arg9[%c0_77, %c0_78] : memref<2x32xf32, #tpu.memory_space<vmem>>, vector<2x32xf32>
    tpu.vector_store %arg9[%c0_77, %c0_78], %389 {strides = array<i32>} : memref<2x32xf32, #tpu.memory_space<vmem>>, vector<2x32xf32>,
    %c0_79 = arith.constant 0 : index
    %c0_80 = arith.constant 0 : index
    %402 = vector.load %arg10[%c0_79, %c0_80] : memref<2x32xf32, #tpu.memory_space<vmem>>, vector<2x32xf32>
    tpu.vector_store %arg10[%c0_79, %c0_80], %396 {strides = array<i32>} : memref<2x32xf32, #tpu.memory_space<vmem>>, vector<2x32xf32>,
    %c0_81 = arith.constant 0 : index
    %c0_82 = arith.constant 0 : index
    %403 = vector.load %arg6[%c0_81, %c0_82] : memref<32x32xf32, #tpu.memory_space<vmem>>, vector<32x32xf32>
    %cst_83 = arith.constant dense<0.000000e+00> : vector<2x32xf32>
    %404 = tpu.matmul %389, %403, %cst_83 {dimension_numbers = #tpu.dot_dimension_numbers<[1], [0], [0], [1], [0, 0, 1, 1], [], []>} : vector<2x32xf32>, vector<32x32xf32>, vector<2x32xf32> -> vector<2x32xf32>
    %c0_84 = arith.constant 0 : index
    %c0_85 = arith.constant 0 : index
    %405 = vector.load %arg7[%c0_84, %c0_85] : memref<1x32xf32, #tpu.memory_space<vmem>>, vector<1x32xf32>
    %406 = vector.broadcast %405 : vector<1x32xf32> to vector<2x32xf32>
    %407 = arith.addf %404, %406 : vector<2x32xf32>
    %408 = math.tanh %407 : vector<2x32xf32>
    %c0_86 = arith.constant 0 : index
    %c0_87 = arith.constant 0 : index
    %409 = vector.load %arg11[%c0_86, %c0_87] : memref<2x32xf32, #tpu.memory_space<vmem>>, vector<2x32xf32>
    tpu.vector_store %arg11[%c0_86, %c0_87], %408 {strides = array<i32>} : memref<2x32xf32, #tpu.memory_space<vmem>>, vector<2x32xf32>,
    return
  }
  func.func @transform_0(%arg0: i32) -> (i32, i32, i32) {
    %c0_i32 = arith.constant 0 : i32
    %c0_i32_0 = arith.constant 0 : i32
    %c0_i32_1 = arith.constant 0 : i32
    %c0_i32_2 = arith.constant 0 : i32
    return %c0_i32, %c0_i32_0, %c0_i32_1 : i32, i32, i32
  }
  func.func @transform_1(%arg0: i32) -> (i32, i32) {
    %c0_i32 = arith.constant 0 : i32
    %c0_i32_0 = arith.constant 0 : i32
    %c0_i32_1 = arith.constant 0 : i32
    return %c0_i32, %c0_i32_0 : i32, i32
  }
  func.func @transform_2(%arg0: i32) -> (i32, i32) {
    %c0_i32 = arith.constant 0 : i32
    %c0_i32_0 = arith.constant 0 : i32
    %c0_i32_1 = arith.constant 0 : i32
    return %c0_i32, %c0_i32_0 : i32, i32
  }
  func.func @transform_3(%arg0: i32) -> (i32, i32) {
    %c0_i32 = arith.constant 0 : i32
    %c0_i32_0 = arith.constant 0 : i32
    %c0_i32_1 = arith.constant 0 : i32
    return %c0_i32, %c0_i32_0 : i32, i32
  }
  func.func @transform_4(%arg0: i32) -> (i32, i32) {
    %c0_i32 = arith.constant 0 : i32
    %c0_i32_0 = arith.constant 0 : i32
    %c0_i32_1 = arith.constant 0 : i32
    return %c0_i32, %c0_i32_0 : i32, i32
  }
  func.func @transform_5(%arg0: i32) -> (i32, i32) {
    %c0_i32 = arith.constant 0 : i32
    %c0_i32_0 = arith.constant 0 : i32
    %c0_i32_1 = arith.constant 0 : i32
    return %c0_i32, %c0_i32_0 : i32, i32
  }
  func.func @transform_6(%arg0: i32) -> (i32, i32) {
    %c0_i32 = arith.constant 0 : i32
    %c0_i32_0 = arith.constant 0 : i32
    %c0_i32_1 = arith.constant 0 : i32
    return %c0_i32, %c0_i32_0 : i32, i32
  }
  func.func @transform_7(%arg0: i32) -> (i32, i32, i32) {
    %c0_i32 = arith.constant 0 : i32
    %c0_i32_0 = arith.constant 0 : i32
    %c0_i32_1 = arith.constant 0 : i32
    %c0_i32_2 = arith.constant 0 : i32
    return %c0_i32, %c0_i32_0, %c0_i32_1 : i32, i32, i32
  }
  func.func @transform_8(%arg0: i32) -> (i32, i32) {
    %c0_i32 = arith.constant 0 : i32
    %c0_i32_0 = arith.constant 0 : i32
    %c0_i32_1 = arith.constant 0 : i32
    return %c0_i32, %c0_i32_0 : i32, i32
  }
  func.func @transform_9(%arg0: i32) -> (i32, i32) {
    %c0_i32 = arith.constant 0 : i32
    %c0_i32_0 = arith.constant 0 : i32
    %c0_i32_1 = arith.constant 0 : i32
    return %c0_i32, %c0_i32_0 : i32, i32
  }
  func.func @transform_10(%arg0: i32) -> (i32, i32) {
    %c0_i32 = arith.constant 0 : i32
    %c0_i32_0 = arith.constant 0 : i32
    %c0_i32_1 = arith.constant 0 : i32
    return %c0_i32, %c0_i32_0 : i32, i32
  }
}

</mosaic_0001>

<bundles_post_ra>
// kernel: tpu_custom_call.1
= control target key start
LH: loop header
LB: loop body
LE: loop exit
PB: predicated region body
PF: predicated region fallthrough
CT: control target
= control target key end

     0   :  { %16 = vsyncpa [#allocation3], 0  ;;  %s3010_s0 = inlined_call_operand.hbm [shape: f32[2,8,16], index: 0, kind: input, shape index: {}]   ;;  %s3011_s1 = inlined_call_operand.vmem [shape: s32[2,1], index: 1, kind: input, shape index: {}]   ;;  %s3012_s2 = inlined_call_operand.hbm [shape: f32[16,128], index: 2, kind: input, shape index: {}]   ;;  %s3013_s3 = inlined_call_operand.hbm [shape: f32[32,128], index: 3, kind: input, shape index: {}]   ;;  %s3014_s4 = inlined_call_operand.vmem [shape: f32[1,128], index: 4, kind: input, shape index: {}]   ;;  %s3015_s5 = inlined_call_operand.hbm [shape: f32[32,32], index: 5, kind: input, shape index: {}]   ;;  %s3016_s6 = inlined_call_operand.vmem [shape: f32[1,32], index: 6, kind: input, shape index: {}]   ;;  %s3017_s7 = inlined_call_operand.hbm [shape: f32[2,8,32], index: 7, kind: output, shape index: {0}]   ;;  %s3018_s8 = inlined_call_operand.hbm [shape: f32[2,32], index: 8, kind: output, shape index: {1}]   ;;  %s3019_s9 = inlined_call_operand.hbm [shape: f32[2,32], index: 9, kind: output, shape index: {2}]   ;;  %s3020_s10 = inlined_call_operand.hbm [shape: f32[2,32], index: 10, kind: output, shape index: {3}]  }
   0x1   :  { %17 = vsyncpa [#allocation6], 0 }
   0x2   :  { %18 = vsyncpa [#allocation9], 0 }
   0x3   :  { %19 = vsyncpa [#allocation4], 0 }
   0x4   :  { %20 = vsyncpa [#allocation12], 0 }
   0x5   :  { %21 = vsyncpa [#allocation15], 0  ;;  %s2485_s13 = smov [#allocation5]   ;;  %s2486_s15 = smov [#allocation2]  }
   0x6   :  { %s41_s14 = sshll.u32 %s2485_s13, 4  ;;  %s27_s16 = sshll.u32 %s2486_s15, 4  ;;  %s42_s14 = int_to_ptr.vmem [resolvable:$true] %s41_s14  ;;  %s2565_s16 = int_to_ptr.vmem [resolvable:$true] %s27_s16 }
   0x7   :  { %s2297_s19 = scalar_lea.hbm %s3012_s2, 256 }
   0x8   :  { %p2298_p0 = scmp.ne.s32.totalorder %s3012_s2, %s2297_s19  ;;  %p2301_p1 = scmp.lt.u32.totalorder %s2297_s19, %s3012_s2 }
   0xa   :  { %p2303_p2 = pnand %p2301_p1, %p2298_p0 }
   0xc   :  { %2306 = shalt.err (!%p2303_p2)
}
   0xd   :  { %s2307_s24 = scalar_lea.vmem %s42_s14, 256  ;;  %p2312_p4 = scmp.lt.s32.totalorder %s42_s14, %s42_s14 }
   0xe   :  { %p2308_p3 = scmp.ne.s32.totalorder %s42_s14, %s2307_s24  ;;  %p2313_p5 = scmp.lt.s32.totalorder %s2307_s24, %s2307_s24 }
  0x10   :  { %p2314_p6 = por %p2313_p5, %p2312_p4 }
  0x12   :  { %p2315_p7 = pnand %p2314_p6, %p2308_p3 }
  0x14   :  { %2318 = shalt.err (!%p2315_p7)
}
  0x15   :  { %s2487_s25 = smov 128   ;;  %s2488_s26 = smov 8  }
  0x16   :  { %47 = dma.hbm_to_vmem [thread:$0]  %s3012_s2, 256, %s42_s14, [#allocation6], %s2487_s25, %s2487_s25, %s2488_s26  }
  0x17   :  { %s2319_s11 = scalar_lea.hbm %s3010_s0, 256 }
  0x18   :  { %p2320_p8 = scmp.ne.s32.totalorder %s3010_s0, %s2319_s11  ;;  %p2323_p9 = scmp.lt.u32.totalorder %s2319_s11, %s3010_s0 }
  0x1a   :  { %p2325_p10 = pnand %p2323_p9, %p2320_p8 }
  0x1c   :  { %2328 = shalt.err (!%p2325_p10)
}
  0x1d   :  { %s2329_s18 = scalar_lea.vmem %s2565_s16, 256  ;;  %p2334_p12 = scmp.lt.s32.totalorder %s2565_s16, %s2565_s16 }
  0x1e   :  { %p2330_p11 = scmp.ne.s32.totalorder %s2565_s16, %s2329_s18  ;;  %p2335_p13 = scmp.lt.s32.totalorder %s2329_s18, %s2329_s18 }
  0x20   :  { %p2336_p0 = por %p2335_p13, %p2334_p12 }
  0x22   :  { %p2337_p1 = pnand %p2336_p0, %p2330_p11 }
  0x24   :  { %2340 = shalt.err (!%p2337_p1)
}
  0x25   :  { %33 = dma.hbm_to_vmem [thread:$0]  %s3010_s0, 256, %s2565_s16, [#allocation3], %s2487_s25, %s2487_s25, %s2488_s26  }
  0x26   :  { %s2489_s19 = smov [#allocation7]   ;;  %s2490_s21 = smov [#allocation8]  }
  0x27   :  { %s53_s20 = sshll.u32 %s2489_s19, 4  ;;  %s67_s22 = sshll.u32 %s2490_s21, 4  ;;  %s54_s20 = int_to_ptr.vmem [resolvable:$true] %s53_s20  ;;  %s2602_s22 = int_to_ptr.vmem [resolvable:$true] %s67_s22 }
  0x28   :  { %s2341_s27 = scalar_lea.hbm %s3013_s3, 512 }
  0x29   :  { %p2342_p2 = scmp.ne.s32.totalorder %s3013_s3, %s2341_s27  ;;  %p2345_p3 = scmp.lt.u32.totalorder %s2341_s27, %s3013_s3 }
  0x2b   :  { %p2347_p4 = pnand %p2345_p3, %p2342_p2 }
  0x2d   :  { %2350 = shalt.err (!%p2347_p4)
}
  0x2e   :  { %s2351_s0 = scalar_lea.vmem %s54_s20, 512  ;;  %p2356_p6 = scmp.lt.s32.totalorder %s54_s20, %s54_s20 }
  0x2f   :  { %p2352_p5 = scmp.ne.s32.totalorder %s54_s20, %s2351_s0  ;;  %p2357_p7 = scmp.lt.s32.totalorder %s2351_s0, %s2351_s0 }
  0x31   :  { %p2358_p8 = por %p2357_p7, %p2356_p6 }
  0x33   :  { %p2359_p9 = pnand %p2358_p8, %p2352_p5 }
  0x35   :  { %2362 = shalt.err (!%p2359_p9)
}
  0x36   :  { %59 = dma.hbm_to_vmem [thread:$0]  %s3013_s3, 512, %s54_s20, [#allocation6], %s2487_s25, %s2487_s25, %s2488_s26  }
  0x37   :  { %s2363_s17 = scalar_lea.hbm %s3015_s5, 512 }
  0x38   :  { %p2364_p10 = scmp.ne.s32.totalorder %s3015_s5, %s2363_s17  ;;  %p2367_p11 = scmp.lt.u32.totalorder %s2363_s17, %s3015_s5 }
  0x3a   :  { %p2369_p12 = pnand %p2367_p11, %p2364_p10 }
  0x3c   :  { %2372 = shalt.err (!%p2369_p12)
}
  0x3d   :  { %s2373_s21 = scalar_lea.vmem %s2602_s22, 512  ;;  %p2378_p0 = scmp.lt.s32.totalorder %s2602_s22, %s2602_s22 }
  0x3e   :  { %p2374_p13 = scmp.ne.s32.totalorder %s2602_s22, %s2373_s21  ;;  %p2379_p1 = scmp.lt.s32.totalorder %s2373_s21, %s2373_s21 }
  0x40   :  { %p2380_p2 = por %p2379_p1, %p2378_p0 }
  0x42   :  { %p2381_p3 = pnand %p2380_p2, %p2374_p13 }
  0x44   :  { %2384 = shalt.err (!%p2381_p3)
}
  0x45   :  { %73 = dma.hbm_to_vmem [thread:$0]  %s3015_s5, 512, %s2602_s22, [#allocation9], %s2487_s25, %s2487_s25, %s2488_s26  }
  0x46   :  { %2473 = dma.done.wait [#allocation3], 256  }
  0x47   :  { %2474 = vsyncadd [#allocation3], 4294967040 }
  0x48   :  { %2475 = dma.done.wait [#allocation6], 768  }
  0x49   :  { %2476 = vsyncadd [#allocation6], 4294966528 }
  0x4a   :  { %2477 = dma.done.wait [#allocation9], 512  }
  0x4b   :  { %2478 = vsyncadd [#allocation9], 4294966784  ;;  %v2491_v0 = vmov 0.0|0.0   ;;  %vm2492_vm0 = vmmov 0   ;;  %v2493_v1 = vmov 0.0   ;;  %vm99_vm1 = vcmask 130048  }
  0x4c   :  { %2072 = vmatprep.subr.bf16.mxu1 %v2491_v0  ;;  %1977 = vmatprep.mubr.msk.f32.mxu1 %vm2492_vm0, %v2493_v1  ;;  %v90_v2 = vld [vmem:[#allocation5] sm:$0xff]  ;;  %v91_v3 = vld [vmem:[#allocation5 + $0x8] sm:$0xff]  ;;  %v190_v4 = vld [vmem:[#allocation7] sm:$0xff]  ;;  %v2494_v13 = vmov 0   ;;  %s2495_s23 = smov 64   ;;  %s2496_s27 = smov 32   ;;  %v182_v39 = vlaneseq }
  0x4d   :  { %v2068_v5 = vpack.c.bf16 %v91_v3, %v90_v2  ;;  %v191_v6 = vld [vmem:[#allocation7 + $0x8] sm:$0xff]  ;;  %v88_v7 = vld [vmem:[#allocation2] sm:$0xff]  ;;  %v192_v9 = vld [vmem:[#allocation7 + $0x10] sm:$0xff]  ;;  %2151 = vset.pattern.permute.xlu0 %v2494_v13  ;;  %2152 = vset.pattern.permute.xlu1 %v2494_v13  ;;  %vm330_vm3 = vcmask 1041409   ;;  %v2498_v60 = vmov 1966171168  }
  0x4e   :  { %v2642_v8 = vpack.c.bf16 %v191_v6, %v190_v4  ;;  %1966 = vmatprep.mubr.msk.f32.mxu0 %vm99_vm1, %v88_v7  ;;  %v193_v10 = vld [vmem:[#allocation7 + $0x18] sm:$0xff]  ;;  %v89_v11 = vld [vmem:[#allocation2 + $0x8] sm:$0xff]  ;;  %v1884_v16 = vld [vmem:[%s3014_s4] ss:$0 sm:$0xff]  ;;  %v183_v40 = vand.u32 127, %v182_v39  ;;  %v355_v61 = vunpack.c.l.s4 %v2498_v60  ;;  %v358_v63 = vshrl.u32 %v182_v39, 7 }
  0x4f   :  { %2069 = vmatprep.subr.bf16.mxu0 %v2068_v5  ;;  %v2646_v12 = vpack.c.bf16 %v193_v10, %v192_v9  ;;  %v181_v26 = vld [vmem:[%s3011_s1] sm:$0x3]  ;;  %s2497_s1 = smov 96   ;;  %vm194_vm4 = vcmask 261120   ;;  %vm378_vm5 = vcmask 253952   ;;  %vm1735_vm6 = vcmask 254976  }
  0x50   :  { %2074 = vmatpush3.bf16.msra.mxu1 %v2642_v8  ;;  %2071 = vmatpush3.bf16.msra.mxu0 %v2068_v5  ;;  %v356_v62 = vunpack.c.0.s8 %v355_v61  ;;  %s2506_s28 = smov [#allocation11]  }
  0x51   :  { %2075 = vmatprep.subr.bf16.mxu1 %v2491_v0  ;;  %2078 = vmatprep.subr.bf16.mxu0 %v2491_v0  ;;  %s1842_s29 = sshll.u32 %s2506_s28, 4  ;;  %s1843_s29 = int_to_ptr.vmem [resolvable:$true] %s1842_s29 }
  0x52   :  { %v2696_v3 = vsub.s32 %v356_v62, %v358_v63  ;;  %s2385_s30 = scalar_lea.vmem %s1843_s29, 32  ;;  %p2390_p5 = scmp.lt.s32.totalorder %s1843_s29, %s1843_s29 }
  0x53   :  { %1967 = vmatmul.mubr.msk.f32.vlgmr.msra.gmra.mrb[0].mxu0 %vm99_vm1, %v89_v11  ;;  %p2386_p4 = scmp.ne.s32.totalorder %s1843_s29, %s2385_s30  ;;  %p2391_p6 = scmp.lt.s32.totalorder %s2385_s30, %s2385_s30 }
  0x54   :  { %2077 = vmatpush3.bf16.msra.mxu1 %v2646_v12  ;;  %2080 = vmatpush3.bf16.msra.mxu0 %v2642_v8 }
  0x55   :  { %2081 = vmatprep.subr.bf16.mxu0 %v2491_v0  ;;  %1988 = vmatprep.mubr.msk.f32.mxu0 %vm2492_vm0, %v2493_v1  ;;  %p2392_p7 = por %p2391_p6, %p2390_p5 }
  0x56   :  { %2084 = vmatprep.subr.bf16.mxu1 %v2491_v0 }
  0x57   :  { %1978 = vmatmul.mubr.f32.vlgmr.msra.gmra.mrb[0].mxu1 %v2493_v1  ;;  %p2393_p8 = pnand %p2392_p7, %p2386_p4 }
  0x58   :  { %2083 = vmatpush3.bf16.msra.mxu0 %v2646_v12  ;;  %2086 = vmatpush3.bf16.msra.mxu1 %v2642_v8 }
  0x59   :  { %2087 = vmatprep.subr.bf16.mxu1 %v2491_v0  ;;  %1999 = vmatprep.mubr.msk.f32.mxu1 %vm2492_vm0, %v2493_v1 }
  0x5a   :  { %2090 = vmatprep.subr.bf16.mxu0 %v2491_v0 }
  0x5c   :  { %2089 = vmatpush3.bf16.msra.mxu1 %v2646_v12 }
  0x5d   :  { %2096 = vmatprep.subr.bf16.mxu1 %v2491_v0 }
 0x126   :  { %v1968_v14 = vpop.f32.mrb[0].mxu0 }
 0x127   :  { %v172_v15 = vpop.f32.mrb[1].mxu0  ;;  %v2669_v17 = vadd.f32 %v1968_v14, %v1884_v16 }
 0x128   :  { %v2671_v21 = vadd.f32 %v1884_v16, %v172_v15 }
 0x12a   :  { %v264_v18 = vpop.f32.mrb[0].mxu1 }
 0x12b   :  { %v269_v19 = vrot.slane %v264_v18, 1  ;;  %v1979_v20 = vpop.f32.mrb[1].mxu1  ;;  %v272_v23 = vadd.f32 %v264_v18, %v2671_v21 }
 0x12d   :  { %v273_v22 = vadd.f32 %v269_v19, %v2669_v17  ;;  %v1888_v28 = vmul.f32 -1.442695, %v272_v23 }
 0x12f   :  { %2167 = vtanh.f32 %v273_v22  ;;  %v1889_v27 = vmul.f32 -1.442695, %v273_v22 }
 0x130   :  { %2169 = vtanh.f32 %v272_v23 }
 0x131   :  { %2171 = vpow2.f32 %v1889_v27 }
 0x132   :  { %2173 = vpow2.f32 %v1888_v28 }
 0x139   :  { %v2168_v24 = vpop.eup %2167 }
 0x13a   :  { %294 = vrot.lane.b32.xlu0 %v2168_v24, %s2495_s23  ;;  %v2170_v25 = vpop.eup %2169 }
 0x13b   :  { %v2172_v29 = vpop.eup %2171 }
 0x13c   :  { %v281_v30 = vadd.f32 1.0, %v2172_v29  ;;  %v2174_v31 = vpop.eup %2173 }
 0x13d   :  { %v280_v32 = vadd.f32 1.0, %v2174_v31 }
 0x13e   :  { %292 = vrot.lane.b32.xlu0 %v2170_v25, %s2495_s23  ;;  %2175 = vrcp.f32 %v281_v30 }
 0x13f   :  { %2177 = vrcp.f32 %v280_v32 }
 0x142   :  { %185 = vperm.xlu0 %2151, %v181_v26  }
 0x148   :  { %v2176_v33 = vpop.eup %2175 }
 0x149   :  { %v2178_v36 = vpop.eup %2177  ;;  %v289_v43 = vmul.f32 0.0, %v2176_v33 }
 0x14a   :  { %v288_v46 = vmul.f32 0.0, %v2178_v36 }
 0x1ac   :  { %v295_v34 = vpop.permute.xlu0 %294 }
 0x1ad   :  { %v299_v35 = vmul.f32 %v2176_v33, %v295_v34 }
 0x1af   :  { %304 = vrot.lane.b32.xlu1 %v299_v35, %s2496_s27 }
 0x1b0   :  { %v293_v37 = vpop.permute.xlu0 %292 }
 0x1b1   :  { %v298_v38 = vmul.f32 %v2178_v36, %v293_v37 }
 0x1b3   :  { %302 = vrot.lane.b32.xlu1 %v298_v38, %s2496_s27 }
 0x1c1   :  { %v186_v41 = vpop.permute.xlu0 %185 }
 0x1c2   :  { %vm187_vm2 = vcmp.lt.s32.totalorder %v183_v40, %v186_v41  ;;  %v2499_v40 = vmov 1  }
 0x1c3   :  { %v2683_v42 = vsel %vm187_vm2, 1.0, %v2493_v1 }
 0x1c4   :  { %324 = vperm.xlu0 %2151, %v2683_v42   ;;  %v2688_v51 = vsub.f32 1.0, %v2683_v42 }
 0x1c8   :  { %2153 = vset.pattern.permute.xlu0 %v2499_v40 }
 0x221   :  { %v305_v44 = vpop.permute.xlu1 %304 }
 0x222   :  { %v309_v45 = vadd.f32 %v305_v44, %v289_v43 }
 0x224   :  { %2179 = vtanh.f32 %v309_v45  ;;  %v346_v52 = vrot.slane %v309_v45, 7 }
 0x225   :  { %v303_v47 = vpop.permute.xlu1 %302 }
 0x226   :  { %v308_v48 = vadd.f32 %v303_v47, %v288_v46 }
 0x228   :  { %2181 = vtanh.f32 %v308_v48  ;;  %v347_v53 = vsel %vm330_vm3, %v346_v52, %v308_v48 }
 0x22e   :  { %v2180_v49 = vpop.eup %2179 }
 0x22f   :  { %316 = vrot.lane.b32.xlu1 %v2180_v49, %s2495_s23 }
 0x232   :  { %v2182_v50 = vpop.eup %2181 }
 0x233   :  { %314 = vrot.lane.b32.xlu1 %v2182_v50, %s2495_s23 }
 0x237   :  { %339 = vperm.xlu1 %2152, %v2688_v51  }
 0x23b   :  { %348 = vrot.lane.b32.xlu1 %v347_v53, %s2497_s1 }
 0x23c   :  { %2154 = vset.pattern.permute.xlu1 %v2499_v40  ;;  %v2500_v40 = vmov 2  }
 0x243   :  { %v325_v2 = vpop.permute.xlu0 %324 }
 0x2a1   :  { %v317_v54 = vpop.permute.xlu1 %316 }
 0x2a2   :  { %v321_v55 = vmul.f32 %v2176_v33, %v317_v54 }
 0x2a4   :  { %v329_v57 = vrot.slane %v321_v55, 7 }
 0x2a5   :  { %v315_v56 = vpop.permute.xlu1 %314 }
 0x2a6   :  { %v320_v58 = vmul.f32 %v2178_v36, %v315_v56 }
 0x2a8   :  { %v331_v59 = vsel %vm330_vm3, %v329_v57, %v320_v58 }
 0x2a9   :  { %332 = vrot.lane.b32.xlu0 %v331_v59, %s2496_s27 }
 0x2b6   :  { %v340_v4 = vpop.permute.xlu1 %339 }
 0x2b7   :  { %v342_v6 = vmul.f32 0.0, %v340_v4 }
 0x2ba   :  { %v349_v22 = vpop.permute.xlu1 %348 }
 0x2bb   :  { %v351_v23 = vmul.f32 %v349_v22, %v325_v2 }
 0x2bd   :  { %v2716_v25 = vadd.f32 %v351_v23, %v342_v6 }
 0x2bf   :  { %v475_v27 = vrot.slane %v2716_v25, 7 }
 0x31b   :  { %v333_v5 = vpop.permute.xlu0 %332 }
 0x31c   :  { %v335_v7 = vmul.f32 %v333_v5, %v325_v2 }
 0x31e   :  { %v2698_v9 = vadd.f32 %v342_v6, %v335_v7  ;;  %v360_v10 = vrot.slane %v335_v7, %v2696_v3 }
 0x320   :  { %v361_v11 = vcombine.high %v360_v10, %v360_v10  ;;  %v368_v13 = vrot.slane %v360_v10, %v2696_v3  ;;  %1989 = vmatmul.mubr.msk.f32.vlgmr.msra.gmra.mrb[2].mxu0 %vm194_vm4, %v2698_v9 }
 0x321   :  { %2092 = vmatpush3.bf16.msra.mxu0 %v2642_v8  ;;  %2010 = vmatprep.mubr.msk.f32.mxu0 %vm2492_vm0, %v2493_v1 }
 0x322   :  { %v375_v14 = vrot.slane %v361_v11, %v2696_v3  ;;  %379 = vst.msk [vmem:[#allocation10] sm:$0x1] %vm378_vm5, %v368_v13  ;;  %2093 = vmatprep.subr.bf16.mxu0 %v2491_v0 }
 0x324   :  { %380 = vst.msk [vmem:[#allocation10 + $0x8] sm:$0x1] %vm378_vm5, %v375_v14 }
 0x325   :  { %2095 = vmatpush3.bf16.msra.mxu0 %v2646_v12 }
 0x326   :  { %2102 = vmatprep.subr.bf16.mxu0 %v2491_v0 }
 0x3f3   :  { %v450_v15 = vpop.f32.mrb[2].mxu0 }
 0x3f4   :  { %v455_v16 = vrot.slane %v450_v15, 7  ;;  %v459_v18 = vadd.f32 %v450_v15, %v2669_v17  ;;  %v1990_v19 = vpop.f32.mrb[3].mxu0 }
 0x3f6   :  { %v458_v20 = vadd.f32 %v455_v16, %v2671_v21  ;;  %2183 = vtanh.f32 %v459_v18  ;;  %v1892_v28 = vmul.f32 -1.442695, %v459_v18 }
 0x3f8   :  { %2185 = vtanh.f32 %v458_v20  ;;  %v1891_v29 = vmul.f32 -1.442695, %v458_v20 }
 0x3f9   :  { %2187 = vpow2.f32 %v1892_v28 }
 0x3fa   :  { %2189 = vpow2.f32 %v1891_v29 }
 0x400   :  { %v2184_v24 = vpop.eup %2183 }
 0x401   :  { %488 = vrot.lane.b32.xlu1 %v2184_v24, %s2495_s23 }
 0x402   :  { %v2186_v26 = vpop.eup %2185 }
 0x403   :  { %486 = vrot.lane.b32.xlu0 %v2186_v26, %s2495_s23  ;;  %v2188_v30 = vpop.eup %2187 }
 0x404   :  { %v2190_v31 = vpop.eup %2189  ;;  %v467_v32 = vadd.f32 1.0, %v2188_v30 }
 0x405   :  { %478 = vrot.lane.b32.xlu1 %v2716_v25, %s2496_s27  ;;  %v466_v33 = vadd.f32 1.0, %v2190_v31 }
 0x406   :  { %2191 = vrcp.f32 %v467_v32 }
 0x407   :  { %476 = vrot.lane.b32.xlu0 %v475_v27, %s2496_s27  ;;  %2193 = vrcp.f32 %v466_v33 }
 0x410   :  { %v2192_v34 = vpop.eup %2191 }
 0x411   :  { %v2194_v37 = vpop.eup %2193 }
 0x473   :  { %v489_v35 = vpop.permute.xlu1 %488 }
 0x474   :  { %v493_v36 = vmul.f32 %v2192_v34, %v489_v35 }
 0x475   :  { %v487_v38 = vpop.permute.xlu0 %486 }
 0x476   :  { %498 = vrot.lane.b32.xlu1 %v493_v36, %s2496_s27  ;;  %v492_v39 = vmul.f32 %v2194_v37, %v487_v38 }
 0x477   :  { %v479_v41 = vpop.permute.xlu1 %478 }
 0x478   :  { %496 = vrot.lane.b32.xlu0 %v492_v39, %s2496_s27  ;;  %v483_v43 = vmul.f32 %v2192_v34, %v479_v41 }
 0x479   :  { %v477_v44 = vpop.permute.xlu0 %476 }
 0x47a   :  { %v482_v47 = vmul.f32 %v2194_v37, %v477_v44 }
 0x4e8   :  { %v499_v45 = vpop.permute.xlu1 %498 }
 0x4e9   :  { %v503_v46 = vadd.f32 %v499_v45, %v483_v43 }
 0x4ea   :  { %v497_v48 = vpop.permute.xlu0 %496 }
 0x4eb   :  { %2195 = vtanh.f32 %v503_v46  ;;  %v502_v49 = vadd.f32 %v497_v48, %v482_v47 }
 0x4ed   :  { %2197 = vtanh.f32 %v502_v49  ;;  %v536_v53 = vrot.slane %v502_v49, 1 }
 0x4ef   :  { %v537_v54 = vsel %vm330_vm3, %v503_v46, %v536_v53 }
 0x4f5   :  { %v2196_v50 = vpop.eup %2195 }
 0x4f6   :  { %510 = vrot.lane.b32.xlu1 %v2196_v50, %s2495_s23 }
 0x4f7   :  { %v2198_v52 = vpop.eup %2197 }
 0x4f8   :  { %508 = vrot.lane.b32.xlu0 %v2198_v52, %s2495_s23 }
 0x4fa   :  { %529 = vperm.xlu1 %2154, %v2688_v51  }
 0x4fc   :  { %517 = vperm.xlu0 %2153, %v2683_v42  }
 0x4fe   :  { %2155 = vset.pattern.permute.xlu1 %v2500_v40 }
 0x500   :  { %538 = vrot.lane.b32.xlu0 %v537_v54, %s2497_s1 }
 0x501   :  { %2156 = vset.pattern.permute.xlu0 %v2500_v40 }
 0x568   :  { %v511_v55 = vpop.permute.xlu1 %510 }
 0x569   :  { %v515_v58 = vmul.f32 %v2192_v34, %v511_v55 }
 0x56a   :  { %v509_v56 = vpop.permute.xlu0 %508 }
 0x56b   :  { %v514_v57 = vmul.f32 %v2194_v37, %v509_v56 }
 0x56d   :  { %v522_v59 = vrot.slane %v514_v57, 1 }
 0x56f   :  { %v523_v60 = vsel %vm330_vm3, %v515_v58, %v522_v59 }
 0x570   :  { %524 = vrot.lane.b32.xlu1 %v523_v60, %s2496_s27 }
 0x579   :  { %v530_v61 = vpop.permute.xlu1 %529 }
 0x57a   :  { %v532_v2 = vmul.f32 %v530_v61, %v2698_v9  ;;  %v542_v22 = vmul.f32 %v530_v61, %v2716_v25 }
 0x57b   :  { %v518_v62 = vpop.permute.xlu0 %517 }
 0x57f   :  { %v539_v19 = vpop.permute.xlu0 %538 }
 0x580   :  { %v541_v20 = vmul.f32 %v539_v19, %v518_v62 }
 0x582   :  { %v2752_v23 = vadd.f32 %v542_v22, %v541_v20 }
 0x584   :  { %v666_v27 = vrot.slane %v2752_v23, 6  ;;  %v667_v28 = vrot.slane %v2752_v23, 7 }
 0x5e2   :  { %v525_v63 = vpop.permute.xlu1 %524 }
 0x5e3   :  { %v527_v4 = vmul.f32 %v525_v63, %v518_v62 }
 0x5e5   :  { %v2734_v5 = vadd.f32 %v532_v2, %v527_v4  ;;  %v551_v6 = vrot.slane %v527_v4, %v2696_v3 }
 0x5e7   :  { %v552_v7 = vcombine.high %v551_v6, %v551_v6  ;;  %v559_v10 = vrot.slane %v551_v6, %v2696_v3  ;;  %2000 = vmatmul.mubr.msk.f32.vlgmr.msra.gmra.mrb[2].mxu1 %vm194_vm4, %v2734_v5 }
 0x5e8   :  { %2098 = vmatpush3.bf16.msra.mxu1 %v2642_v8  ;;  %2021 = vmatprep.mubr.msk.f32.mxu1 %vm2492_vm0, %v2493_v1 }
 0x5e9   :  { %v566_v11 = vrot.slane %v552_v7, %v2696_v3  ;;  %569 = vst.msk [vmem:[#allocation10 + $0x1] sm:$0x1] %vm378_vm5, %v559_v10  ;;  %2099 = vmatprep.subr.bf16.mxu1 %v2491_v0 }
 0x5eb   :  { %570 = vst.msk [vmem:[#allocation10 + $0x9] sm:$0x1] %vm378_vm5, %v566_v11 }
 0x5ec   :  { %2101 = vmatpush3.bf16.msra.mxu1 %v2646_v12 }
 0x5ed   :  { %2108 = vmatprep.subr.bf16.mxu1 %v2491_v0 }
 0x6ba   :  { %v640_v9 = vpop.f32.mrb[2].mxu1 }
 0x6bb   :  { %v645_v13 = vrot.slane %v640_v9, 6  ;;  %v646_v14 = vrot.slane %v640_v9, 7  ;;  %v2001_v15 = vpop.f32.mrb[3].mxu1 }
 0x6bd   :  { %v649_v16 = vadd.f32 %v645_v13, %v2671_v21  ;;  %v650_v18 = vadd.f32 %v646_v14, %v2669_v17 }
 0x6bf   :  { %2199 = vtanh.f32 %v649_v16  ;;  %v1894_v29 = vmul.f32 -1.442695, %v649_v16  ;;  %v1895_v30 = vmul.f32 -1.442695, %v650_v18 }
 0x6c0   :  { %2201 = vtanh.f32 %v650_v18 }
 0x6c1   :  { %2203 = vpow2.f32 %v1894_v29 }
 0x6c2   :  { %2205 = vpow2.f32 %v1895_v30 }
 0x6c9   :  { %v2200_v24 = vpop.eup %2199 }
 0x6ca   :  { %v2202_v26 = vpop.eup %2201  ;;  %678 = vrot.lane.b32.xlu1 %v2200_v24, %s2495_s23 }
 0x6cb   :  { %680 = vrot.lane.b32.xlu0 %v2202_v26, %s2495_s23  ;;  %v2204_v25 = vpop.eup %2203 }
 0x6cc   :  { %v2206_v31 = vpop.eup %2205  ;;  %v657_v32 = vadd.f32 1.0, %v2204_v25 }
 0x6cd   :  { %v658_v33 = vadd.f32 1.0, %v2206_v31 }
 0x6ce   :  { %668 = vrot.lane.b32.xlu1 %v666_v27, %s2496_s27  ;;  %2207 = vrcp.f32 %v657_v32 }
 0x6cf   :  { %670 = vrot.lane.b32.xlu0 %v667_v28, %s2496_s27  ;;  %2209 = vrcp.f32 %v658_v33 }
 0x6d8   :  { %v2208_v34 = vpop.eup %2207 }
 0x6d9   :  { %v2210_v36 = vpop.eup %2209 }
 0x73c   :  { %v679_v35 = vpop.permute.xlu1 %678 }
 0x73d   :  { %v681_v37 = vpop.permute.xlu0 %680  ;;  %v684_v38 = vmul.f32 %v2208_v34, %v679_v35 }
 0x73e   :  { %v685_v39 = vmul.f32 %v2210_v36, %v681_v37 }
 0x73f   :  { %688 = vrot.lane.b32.xlu1 %v684_v38, %s2496_s27 }
 0x740   :  { %690 = vrot.lane.b32.xlu0 %v685_v39, %s2496_s27  ;;  %v669_v41 = vpop.permute.xlu1 %668 }
 0x741   :  { %v671_v43 = vpop.permute.xlu0 %670  ;;  %v674_v44 = vmul.f32 %v2208_v34, %v669_v41 }
 0x742   :  { %v675_v45 = vmul.f32 %v2210_v36, %v671_v43  ;;  %v2501_v43 = vmov 3  }
 0x7b1   :  { %v689_v46 = vpop.permute.xlu1 %688 }
 0x7b2   :  { %v691_v47 = vpop.permute.xlu0 %690  ;;  %v694_v48 = vadd.f32 %v689_v46, %v674_v44 }
 0x7b3   :  { %v695_v49 = vadd.f32 %v691_v47, %v675_v45 }
 0x7b4   :  { %2211 = vtanh.f32 %v694_v48  ;;  %v729_v50 = vrot.slane %v694_v48, 2 }
 0x7b5   :  { %2213 = vtanh.f32 %v695_v49  ;;  %v730_v52 = vrot.slane %v695_v49, 1 }
 0x7b7   :  { %v731_v53 = vsel %vm330_vm3, %v730_v52, %v729_v50 }
 0x7be   :  { %v2212_v54 = vpop.eup %2211 }
 0x7bf   :  { %v2214_v55 = vpop.eup %2213  ;;  %700 = vrot.lane.b32.xlu1 %v2212_v54, %s2495_s23 }
 0x7c0   :  { %702 = vrot.lane.b32.xlu0 %v2214_v55, %s2495_s23 }
 0x7c3   :  { %709 = vperm.xlu1 %2155, %v2683_v42  }
 0x7c4   :  { %722 = vperm.xlu0 %2156, %v2688_v51  }
 0x7c7   :  { %2158 = vset.pattern.permute.xlu1 %v2501_v43 }
 0x7c8   :  { %2157 = vset.pattern.permute.xlu0 %v2501_v43 }
 0x831   :  { %v701_v56 = vpop.permute.xlu1 %700 }
 0x832   :  { %v703_v57 = vpop.permute.xlu0 %702  ;;  %v706_v58 = vmul.f32 %v2208_v34, %v701_v56 }
 0x833   :  { %v707_v59 = vmul.f32 %v2210_v36, %v703_v57 }
 0x834   :  { %v714_v60 = vrot.slane %v706_v58, 2 }
 0x835   :  { %v715_v61 = vrot.slane %v707_v59, 1 }
 0x837   :  { %v716_v62 = vsel %vm330_vm3, %v715_v61, %v714_v60 }
 0x838   :  { %717 = vrot.lane.b32.xlu1 %v716_v62, %s2496_s27 }
 0x83c   :  { %732 = vrot.lane.b32.xlu1 %v731_v53, %s2497_s1 }
 0x842   :  { %v710_v63 = vpop.permute.xlu1 %709 }
 0x843   :  { %v723_v2 = vpop.permute.xlu0 %722 }
 0x844   :  { %v725_v6 = vmul.f32 %v723_v2, %v2734_v5  ;;  %v736_v26 = vmul.f32 %v723_v2, %v2752_v23 }
 0x8aa   :  { %v718_v4 = vpop.permute.xlu1 %717 }
 0x8ab   :  { %v720_v7 = vmul.f32 %v718_v4, %v710_v63 }
 0x8ad   :  { %v2771_v10 = vadd.f32 %v725_v6, %v720_v7  ;;  %v745_v11 = vrot.slane %v720_v7, %v2696_v3 }
 0x8ae   :  { %v733_v22 = vpop.permute.xlu1 %732 }
 0x8af   :  { %v746_v9 = vcombine.high %v745_v11, %v745_v11  ;;  %v753_v13 = vrot.slane %v745_v11, %v2696_v3  ;;  %2011 = vmatmul.mubr.msk.f32.vlgmr.msra.gmra.mrb[4].mxu0 %vm194_vm4, %v2771_v10  ;;  %v735_v24 = vmul.f32 %v733_v22, %v710_v63 }
 0x8b0   :  { %2104 = vmatpush3.bf16.msra.mxu0 %v2642_v8  ;;  %2032 = vmatprep.mubr.msk.f32.mxu0 %vm2492_vm0, %v2493_v1 }
 0x8b1   :  { %v760_v14 = vrot.slane %v746_v9, %v2696_v3  ;;  %763 = vst.msk [vmem:[#allocation10 + $0x2] sm:$0x1] %vm378_vm5, %v753_v13  ;;  %2105 = vmatprep.subr.bf16.mxu0 %v2491_v0  ;;  %v2789_v27 = vadd.f32 %v736_v26, %v735_v24 }
 0x8b3   :  { %764 = vst.msk [vmem:[#allocation10 + $0xa] sm:$0x1] %vm378_vm5, %v760_v14  ;;  %v860_v30 = vrot.slane %v2789_v27, 5  ;;  %v861_v25 = vrot.slane %v2789_v27, 6 }
 0x8b4   :  { %2107 = vmatpush3.bf16.msra.mxu0 %v2646_v12 }
 0x8b5   :  { %2114 = vmatprep.subr.bf16.mxu0 %v2491_v0 }
 0x982   :  { %v834_v5 = vpop.f32.mrb[4].mxu0 }
 0x983   :  { %v839_v15 = vrot.slane %v834_v5, 5  ;;  %v840_v16 = vrot.slane %v834_v5, 6  ;;  %v2012_v18 = vpop.f32.mrb[5].mxu0 }
 0x985   :  { %v843_v19 = vadd.f32 %v839_v15, %v2671_v21  ;;  %v844_v20 = vadd.f32 %v840_v16, %v2669_v17 }
 0x987   :  { %2215 = vtanh.f32 %v843_v19  ;;  %v1897_v31 = vmul.f32 -1.442695, %v843_v19  ;;  %v1898_v32 = vmul.f32 -1.442695, %v844_v20 }
 0x988   :  { %2217 = vtanh.f32 %v844_v20 }
 0x989   :  { %2219 = vpow2.f32 %v1897_v31 }
 0x98a   :  { %2221 = vpow2.f32 %v1898_v32 }
 0x991   :  { %v2216_v28 = vpop.eup %2215 }
 0x992   :  { %v2218_v29 = vpop.eup %2217  ;;  %872 = vrot.lane.b32.xlu0 %v2216_v28, %s2495_s23 }
 0x993   :  { %874 = vrot.lane.b32.xlu1 %v2218_v29, %s2495_s23  ;;  %v2220_v23 = vpop.eup %2219 }
 0x994   :  { %v2222_v33 = vpop.eup %2221  ;;  %v851_v34 = vadd.f32 1.0, %v2220_v23 }
 0x995   :  { %v852_v35 = vadd.f32 1.0, %v2222_v33 }
 0x996   :  { %862 = vrot.lane.b32.xlu0 %v860_v30, %s2496_s27  ;;  %2223 = vrcp.f32 %v851_v34 }
 0x997   :  { %864 = vrot.lane.b32.xlu1 %v861_v25, %s2496_s27  ;;  %2225 = vrcp.f32 %v852_v35 }
 0x9a0   :  { %v2224_v36 = vpop.eup %2223 }
 0x9a1   :  { %v2226_v38 = vpop.eup %2225 }
 0xa04   :  { %v873_v37 = vpop.permute.xlu0 %872 }
 0xa05   :  { %v878_v39 = vmul.f32 %v2224_v36, %v873_v37  ;;  %v875_v40 = vpop.permute.xlu1 %874 }
 0xa06   :  { %v879_v41 = vmul.f32 %v2226_v38, %v875_v40 }
 0xa07   :  { %882 = vrot.lane.b32.xlu0 %v878_v39, %s2496_s27 }
 0xa08   :  { %884 = vrot.lane.b32.xlu1 %v879_v41, %s2496_s27  ;;  %v863_v44 = vpop.permute.xlu0 %862 }
 0xa09   :  { %v865_v45 = vpop.permute.xlu1 %864  ;;  %v868_v46 = vmul.f32 %v2224_v36, %v863_v44 }
 0xa0a   :  { %v869_v47 = vmul.f32 %v2226_v38, %v865_v45  ;;  %v2502_v45 = vmov 4  }
 0xa79   :  { %v883_v48 = vpop.permute.xlu0 %882 }
 0xa7a   :  { %v888_v49 = vadd.f32 %v883_v48, %v868_v46  ;;  %v885_v50 = vpop.permute.xlu1 %884 }
 0xa7b   :  { %v889_v52 = vadd.f32 %v885_v50, %v869_v47 }
 0xa7c   :  { %2227 = vtanh.f32 %v888_v49  ;;  %v923_v55 = vrot.slane %v888_v49, 3 }
 0xa7d   :  { %2229 = vtanh.f32 %v889_v52  ;;  %v924_v56 = vrot.slane %v889_v52, 2 }
 0xa7f   :  { %v925_v57 = vsel %vm330_vm3, %v924_v56, %v923_v55 }
 0xa86   :  { %v2228_v53 = vpop.eup %2227 }
 0xa87   :  { %v2230_v54 = vpop.eup %2229  ;;  %894 = vrot.lane.b32.xlu0 %v2228_v53, %s2495_s23 }
 0xa88   :  { %896 = vrot.lane.b32.xlu1 %v2230_v54, %s2495_s23 }
 0xa8b   :  { %903 = vperm.xlu0 %2157, %v2683_v42  }
 0xa8c   :  { %916 = vperm.xlu1 %2158, %v2688_v51  }
 0xa8f   :  { %926 = vrot.lane.b32.xlu0 %v925_v57, %s2497_s1 }
 0xa90   :  { %2160 = vset.pattern.permute.xlu0 %v2502_v45  ;;  %2159 = vset.pattern.permute.xlu1 %v2502_v45  ;;  %v2503_v45 = vmov 5  }
 0xaf9   :  { %v895_v58 = vpop.permute.xlu0 %894 }
 0xafa   :  { %v900_v59 = vmul.f32 %v2224_v36, %v895_v58  ;;  %v897_v60 = vpop.permute.xlu1 %896 }
 0xafb   :  { %v901_v61 = vmul.f32 %v2226_v38, %v897_v60 }
 0xafc   :  { %v908_v62 = vrot.slane %v900_v59, 3 }
 0xafd   :  { %v909_v63 = vrot.slane %v901_v61, 2 }
 0xaff   :  { %v910_v2 = vsel %vm330_vm3, %v909_v63, %v908_v62 }
 0xb00   :  { %911 = vrot.lane.b32.xlu1 %v910_v2, %s2496_s27 }
 0xb0a   :  { %v904_v6 = vpop.permute.xlu0 %903 }
 0xb0b   :  { %v917_v4 = vpop.permute.xlu1 %916 }
 0xb0c   :  { %v919_v11 = vmul.f32 %v917_v4, %v2771_v10  ;;  %v930_v29 = vmul.f32 %v917_v4, %v2789_v27 }
 0xb0e   :  { %v927_v26 = vpop.permute.xlu0 %926 }
 0xb0f   :  { %v929_v28 = vmul.f32 %v927_v26, %v904_v6 }
 0xb11   :  { %v2826_v30 = vadd.f32 %v930_v29, %v929_v28 }
 0xb13   :  { %v1054_v32 = vrot.slane %v2826_v30, 4  ;;  %v1055_v23 = vrot.slane %v2826_v30, 5 }
 0xb72   :  { %v912_v7 = vpop.permute.xlu1 %911 }
 0xb73   :  { %v914_v9 = vmul.f32 %v912_v7, %v904_v6 }
 0xb75   :  { %v2808_v13 = vadd.f32 %v919_v11, %v914_v9  ;;  %v939_v14 = vrot.slane %v914_v9, %v2696_v3 }
 0xb77   :  { %v940_v5 = vcombine.high %v939_v14, %v939_v14  ;;  %v947_v15 = vrot.slane %v939_v14, %v2696_v3  ;;  %2022 = vmatmul.mubr.msk.f32.vlgmr.msra.gmra.mrb[4].mxu1 %vm194_vm4, %v2808_v13 }
 0xb78   :  { %2110 = vmatpush3.bf16.msra.mxu1 %v2642_v8  ;;  %2043 = vmatprep.mubr.msk.f32.mxu1 %vm2492_vm0, %v2493_v1 }
 0xb79   :  { %v954_v16 = vrot.slane %v940_v5, %v2696_v3  ;;  %957 = vst.msk [vmem:[#allocation10 + $0x3] sm:$0x1] %vm378_vm5, %v947_v15  ;;  %2111 = vmatprep.subr.bf16.mxu1 %v2491_v0 }
 0xb7b   :  { %958 = vst.msk [vmem:[#allocation10 + $0xb] sm:$0x1] %vm378_vm5, %v954_v16 }
 0xb7c   :  { %2113 = vmatpush3.bf16.msra.mxu1 %v2646_v12 }
 0xb7d   :  { %2120 = vmatprep.subr.bf16.mxu1 %v2491_v0 }
 0xc4a   :  { %v1028_v10 = vpop.f32.mrb[4].mxu1 }
 0xc4b   :  { %v1033_v18 = vrot.slane %v1028_v10, 4  ;;  %v1034_v19 = vrot.slane %v1028_v10, 5  ;;  %v2023_v20 = vpop.f32.mrb[5].mxu1 }
 0xc4d   :  { %v1037_v22 = vadd.f32 %v1033_v18, %v2671_v21  ;;  %v1038_v24 = vadd.f32 %v1034_v19, %v2669_v17 }
 0xc4f   :  { %2231 = vtanh.f32 %v1037_v22  ;;  %v1900_v33 = vmul.f32 -1.442695, %v1037_v22  ;;  %v1901_v34 = vmul.f32 -1.442695, %v1038_v24 }
 0xc50   :  { %2233 = vtanh.f32 %v1038_v24 }
 0xc51   :  { %2235 = vpow2.f32 %v1900_v33 }
 0xc52   :  { %2237 = vpow2.f32 %v1901_v34 }
 0xc59   :  { %v2232_v25 = vpop.eup %2231 }
 0xc5a   :  { %v2234_v31 = vpop.eup %2233  ;;  %1066 = vrot.lane.b32.xlu1 %v2232_v25, %s2495_s23 }
 0xc5b   :  { %1068 = vrot.lane.b32.xlu0 %v2234_v31, %s2495_s23  ;;  %v2236_v27 = vpop.eup %2235 }
 0xc5c   :  { %v2238_v35 = vpop.eup %2237  ;;  %v1045_v36 = vadd.f32 1.0, %v2236_v27 }
 0xc5d   :  { %v1046_v37 = vadd.f32 1.0, %v2238_v35 }
 0xc5e   :  { %1056 = vrot.lane.b32.xlu1 %v1054_v32, %s2496_s27  ;;  %2239 = vrcp.f32 %v1045_v36 }
 0xc5f   :  { %1058 = vrot.lane.b32.xlu0 %v1055_v23, %s2496_s27  ;;  %2241 = vrcp.f32 %v1046_v37 }
 0xc68   :  { %v2240_v38 = vpop.eup %2239 }
 0xc69   :  { %v2242_v40 = vpop.eup %2241 }
 0xccc   :  { %v1067_v39 = vpop.permute.xlu1 %1066 }
 0xccd   :  { %v1069_v41 = vpop.permute.xlu0 %1068  ;;  %v1072_v43 = vmul.f32 %v2240_v38, %v1067_v39 }
 0xcce   :  { %v1073_v44 = vmul.f32 %v2242_v40, %v1069_v41 }
 0xccf   :  { %1076 = vrot.lane.b32.xlu1 %v1072_v43, %s2496_s27 }
 0xcd0   :  { %1078 = vrot.lane.b32.xlu0 %v1073_v44, %s2496_s27  ;;  %v1057_v46 = vpop.permute.xlu1 %1056 }
 0xcd1   :  { %v1059_v47 = vpop.permute.xlu0 %1058  ;;  %v1062_v48 = vmul.f32 %v2240_v38, %v1057_v46 }
 0xcd2   :  { %v1063_v49 = vmul.f32 %v2242_v40, %v1059_v47 }
 0xd41   :  { %v1077_v50 = vpop.permute.xlu1 %1076 }
 0xd42   :  { %v1079_v52 = vpop.permute.xlu0 %1078  ;;  %v1082_v53 = vadd.f32 %v1077_v50, %v1062_v48 }
 0xd43   :  { %v1083_v54 = vadd.f32 %v1079_v52, %v1063_v49 }
 0xd44   :  { %2243 = vtanh.f32 %v1082_v53  ;;  %v1117_v55 = vrot.slane %v1082_v53, 4 }
 0xd45   :  { %2245 = vtanh.f32 %v1083_v54  ;;  %v1118_v56 = vrot.slane %v1083_v54, 3 }
 0xd47   :  { %v1119_v57 = vsel %vm330_vm3, %v1118_v56, %v1117_v55 }
 0xd4e   :  { %v2244_v58 = vpop.eup %2243 }
 0xd4f   :  { %v2246_v59 = vpop.eup %2245  ;;  %1088 = vrot.lane.b32.xlu1 %v2244_v58, %s2495_s23 }
 0xd50   :  { %1090 = vrot.lane.b32.xlu0 %v2246_v59, %s2495_s23 }
 0xd53   :  { %1097 = vperm.xlu1 %2159, %v2683_v42  }
 0xd54   :  { %1110 = vperm.xlu0 %2160, %v2688_v51  }
 0xd57   :  { %2162 = vset.pattern.permute.xlu1 %v2503_v45 }
 0xd58   :  { %2161 = vset.pattern.permute.xlu0 %v2503_v45 }
 0xdc1   :  { %v1089_v60 = vpop.permute.xlu1 %1088 }
 0xdc2   :  { %v1091_v61 = vpop.permute.xlu0 %1090  ;;  %v1094_v62 = vmul.f32 %v2240_v38, %v1089_v60 }
 0xdc3   :  { %v1095_v63 = vmul.f32 %v2242_v40, %v1091_v61 }
 0xdc4   :  { %v1102_v2 = vrot.slane %v1094_v62, 4 }
 0xdc5   :  { %v1103_v4 = vrot.slane %v1095_v63, 3 }
 0xdc7   :  { %v1104_v6 = vsel %vm330_vm3, %v1103_v4, %v1102_v2 }
 0xdc8   :  { %1105 = vrot.lane.b32.xlu1 %v1104_v6, %s2496_s27 }
 0xdcc   :  { %1120 = vrot.lane.b32.xlu1 %v1119_v57, %s2497_s1 }
 0xdd2   :  { %v1098_v7 = vpop.permute.xlu1 %1097 }
 0xdd3   :  { %v1111_v11 = vpop.permute.xlu0 %1110 }
 0xdd4   :  { %v1113_v14 = vmul.f32 %v1111_v11, %v2808_v13  ;;  %v1124_v25 = vmul.f32 %v1111_v11, %v2826_v30 }
 0xe3a   :  { %v1106_v9 = vpop.permute.xlu1 %1105 }
 0xe3b   :  { %v1108_v5 = vmul.f32 %v1106_v9, %v1098_v7 }
 0xe3d   :  { %v2845_v15 = vadd.f32 %v1113_v14, %v1108_v5  ;;  %v1133_v16 = vrot.slane %v1108_v5, %v2696_v3 }
 0xe3e   :  { %v1121_v28 = vpop.permute.xlu1 %1120 }
 0xe3f   :  { %v1134_v10 = vcombine.high %v1133_v16, %v1133_v16  ;;  %v1141_v18 = vrot.slane %v1133_v16, %v2696_v3  ;;  %2033 = vmatmul.mubr.msk.f32.vlgmr.msra.gmra.mrb[6].mxu0 %vm194_vm4, %v2845_v15  ;;  %v1123_v29 = vmul.f32 %v1121_v28, %v1098_v7 }
 0xe40   :  { %2116 = vmatpush3.bf16.msra.mxu0 %v2642_v8  ;;  %2054 = vmatprep.mubr.msk.f32.mxu0 %vm2492_vm0, %v2493_v1 }
 0xe41   :  { %v1148_v19 = vrot.slane %v1134_v10, %v2696_v3  ;;  %1151 = vst.msk [vmem:[#allocation10 + $0x4] sm:$0x1] %vm378_vm5, %v1141_v18  ;;  %2117 = vmatprep.subr.bf16.mxu0 %v2491_v0  ;;  %v2862_v31 = vadd.f32 %v1124_v25, %v1123_v29 }
 0xe43   :  { %1152 = vst.msk [vmem:[#allocation10 + $0xc] sm:$0x1] %vm378_vm5, %v1148_v19  ;;  %v1249_v33 = vrot.slane %v2862_v31, 4 }
 0xe44   :  { %2119 = vmatpush3.bf16.msra.mxu0 %v2646_v12  ;;  %v1248_v12 = vrot.slane %v2862_v31, 3 }
 0xf12   :  { %v1222_v13 = vpop.f32.mrb[6].mxu0 }
 0xf13   :  { %v1227_v20 = vrot.slane %v1222_v13, 3  ;;  %v1228_v22 = vrot.slane %v1222_v13, 4  ;;  %v2034_v24 = vpop.f32.mrb[7].mxu0 }
 0xf15   :  { %v1231_v26 = vadd.f32 %v1227_v20, %v2671_v21  ;;  %v1232_v8 = vadd.f32 %v1228_v22, %v2669_v17 }
 0xf17   :  { %2247 = vtanh.f32 %v1231_v26  ;;  %v1903_v34 = vmul.f32 -1.442695, %v1231_v26  ;;  %v1904_v27 = vmul.f32 -1.442695, %v1232_v8 }
 0xf18   :  { %2249 = vtanh.f32 %v1232_v8 }
 0xf19   :  { %2251 = vpow2.f32 %v1903_v34 }
 0xf1a   :  { %2253 = vpow2.f32 %v1904_v27 }
 0xf21   :  { %v2248_v32 = vpop.eup %2247 }
 0xf22   :  { %v2250_v23 = vpop.eup %2249  ;;  %1260 = vrot.lane.b32.xlu0 %v2248_v32, %s2495_s23 }
 0xf23   :  { %1262 = vrot.lane.b32.xlu1 %v2250_v23, %s2495_s23  ;;  %v2252_v30 = vpop.eup %2251 }
 0xf24   :  { %v2254_v35 = vpop.eup %2253  ;;  %v1239_v36 = vadd.f32 1.0, %v2252_v30 }
 0xf25   :  { %v1240_v37 = vadd.f32 1.0, %v2254_v35 }
 0xf26   :  { %1250 = vrot.lane.b32.xlu0 %v1248_v12, %s2496_s27  ;;  %2255 = vrcp.f32 %v1239_v36 }
 0xf27   :  { %1252 = vrot.lane.b32.xlu1 %v1249_v33, %s2496_s27  ;;  %2257 = vrcp.f32 %v1240_v37 }
 0xf30   :  { %v2256_v38 = vpop.eup %2255 }
 0xf31   :  { %v2258_v40 = vpop.eup %2257 }
 0xf94   :  { %v1261_v39 = vpop.permute.xlu0 %1260 }
 0xf95   :  { %v1266_v41 = vmul.f32 %v2256_v38, %v1261_v39  ;;  %v1263_v43 = vpop.permute.xlu1 %1262 }
 0xf96   :  { %v1267_v44 = vmul.f32 %v2258_v40, %v1263_v43 }
 0xf97   :  { %1270 = vrot.lane.b32.xlu0 %v1266_v41, %s2496_s27 }
 0xf98   :  { %1272 = vrot.lane.b32.xlu1 %v1267_v44, %s2496_s27  ;;  %v1251_v46 = vpop.permute.xlu0 %1250  ;;  %v2504_v44 = vmov 6  }
 0xf99   :  { %v1253_v47 = vpop.permute.xlu1 %1252  ;;  %v1256_v48 = vmul.f32 %v2256_v38, %v1251_v46 }
 0xf9a   :  { %v1257_v49 = vmul.f32 %v2258_v40, %v1253_v47 }
0x1009   :  { %v1271_v50 = vpop.permute.xlu0 %1270 }
0x100a   :  { %v1276_v52 = vadd.f32 %v1271_v50, %v1256_v48  ;;  %v1273_v53 = vpop.permute.xlu1 %1272 }
0x100b   :  { %v1277_v54 = vadd.f32 %v1273_v53, %v1257_v49 }
0x100c   :  { %2259 = vtanh.f32 %v1276_v52  ;;  %v1311_v57 = vrot.slane %v1276_v52, 5 }
0x100d   :  { %2261 = vtanh.f32 %v1277_v54  ;;  %v1312_v58 = vrot.slane %v1277_v54, 4 }
0x100f   :  { %v1313_v59 = vsel %vm330_vm3, %v1312_v58, %v1311_v57 }
0x1016   :  { %v2260_v55 = vpop.eup %2259 }
0x1017   :  { %v2262_v56 = vpop.eup %2261  ;;  %1282 = vrot.lane.b32.xlu0 %v2260_v55, %s2495_s23 }
0x1018   :  { %1284 = vrot.lane.b32.xlu1 %v2262_v56, %s2495_s23 }
0x101b   :  { %1291 = vperm.xlu0 %2161, %v2683_v42  }
0x101c   :  { %1304 = vperm.xlu1 %2162, %v2688_v51  }
0x101f   :  { %1314 = vrot.lane.b32.xlu0 %v1313_v59, %s2497_s1 }
0x1020   :  { %2164 = vset.pattern.permute.xlu0 %v2504_v44  ;;  %2163 = vset.pattern.permute.xlu1 %v2504_v44 }
0x1089   :  { %v1283_v60 = vpop.permute.xlu0 %1282 }
0x108a   :  { %v1288_v61 = vmul.f32 %v2256_v38, %v1283_v60  ;;  %v1285_v62 = vpop.permute.xlu1 %1284 }
0x108b   :  { %v1289_v63 = vmul.f32 %v2258_v40, %v1285_v62 }
0x108c   :  { %v1296_v2 = vrot.slane %v1288_v61, 5 }
0x108d   :  { %v1297_v4 = vrot.slane %v1289_v63, 4 }
0x108f   :  { %v1298_v6 = vsel %vm330_vm3, %v1297_v4, %v1296_v2 }
0x1090   :  { %1299 = vrot.lane.b32.xlu1 %v1298_v6, %s2496_s27 }
0x109a   :  { %v1292_v11 = vpop.permute.xlu0 %1291 }
0x109b   :  { %v1305_v7 = vpop.permute.xlu1 %1304 }
0x109c   :  { %v1307_v14 = vmul.f32 %v1305_v7, %v2845_v15 }
0x109e   :  { %v1315_v28 = vpop.permute.xlu0 %1314 }
0x109f   :  { %v1317_v29 = vmul.f32 %v1315_v28, %v1292_v11 }
0x1102   :  { %v1300_v9 = vpop.permute.xlu1 %1299 }
0x1103   :  { %v1302_v5 = vmul.f32 %v1300_v9, %v1292_v11 }
0x1105   :  { %v2881_v16 = vadd.f32 %v1307_v14, %v1302_v5  ;;  %v1327_v10 = vrot.slane %v1302_v5, %v2696_v3 }
0x1107   :  { %v1328_v18 = vcombine.high %v1327_v10, %v1327_v10  ;;  %v1335_v19 = vrot.slane %v1327_v10, %v2696_v3  ;;  %2044 = vmatmul.mubr.msk.f32.vlgmr.msra.gmra.mrb[6].mxu1 %vm194_vm4, %v2881_v16 }
0x1108   :  { %2065 = vmatprep.mubr.msk.f32.mxu1 %vm2492_vm0, %v2493_v1  ;;  %v1318_v1 = vmul.f32 %v1305_v7, %v2862_v31 }
0x1109   :  { %v1342_v13 = vrot.slane %v1328_v18, %v2696_v3  ;;  %1345 = vst.msk [vmem:[#allocation10 + $0x5] sm:$0x1] %vm378_vm5, %v1335_v19 }
0x110a   :  { %v2895_v25 = vadd.f32 %v1318_v1, %v1317_v29 }
0x110b   :  { %1346 = vst.msk [vmem:[#allocation10 + $0xd] sm:$0x1] %vm378_vm5, %v1342_v13 }
0x110c   :  { %v1442_v12 = vrot.slane %v2895_v25, 2  ;;  %v1443_v33 = vrot.slane %v2895_v25, 3 }
0x11da   :  { %v1416_v15 = vpop.f32.mrb[6].mxu1 }
0x11db   :  { %v1421_v20 = vrot.slane %v1416_v15, 2  ;;  %v1422_v22 = vrot.slane %v1416_v15, 3  ;;  %v2045_v24 = vpop.f32.mrb[7].mxu1 }
0x11dd   :  { %v1425_v26 = vadd.f32 %v1421_v20, %v2671_v21  ;;  %v1426_v8 = vadd.f32 %v1422_v22, %v2669_v17 }
0x11df   :  { %2263 = vtanh.f32 %v1425_v26  ;;  %v1906_v34 = vmul.f32 -1.442695, %v1425_v26  ;;  %v1907_v27 = vmul.f32 -1.442695, %v1426_v8 }
0x11e0   :  { %2265 = vtanh.f32 %v1426_v8 }
0x11e1   :  { %2267 = vpow2.f32 %v1906_v34 }
0x11e2   :  { %2269 = vpow2.f32 %v1907_v27 }
0x11e9   :  { %v2264_v32 = vpop.eup %2263 }
0x11ea   :  { %v2266_v23 = vpop.eup %2265  ;;  %1454 = vrot.lane.b32.xlu1 %v2264_v32, %s2495_s23 }
0x11eb   :  { %1456 = vrot.lane.b32.xlu0 %v2266_v23, %s2495_s23  ;;  %v2268_v31 = vpop.eup %2267 }
0x11ec   :  { %v2270_v30 = vpop.eup %2269  ;;  %v1433_v35 = vadd.f32 1.0, %v2268_v31 }
0x11ed   :  { %v1434_v36 = vadd.f32 1.0, %v2270_v30 }
0x11ee   :  { %1444 = vrot.lane.b32.xlu1 %v1442_v12, %s2496_s27  ;;  %2271 = vrcp.f32 %v1433_v35 }
0x11ef   :  { %1446 = vrot.lane.b32.xlu0 %v1443_v33, %s2496_s27  ;;  %2273 = vrcp.f32 %v1434_v36 }
0x11f8   :  { %v2272_v37 = vpop.eup %2271 }
0x11f9   :  { %v2274_v39 = vpop.eup %2273 }
0x125c   :  { %v1455_v38 = vpop.permute.xlu1 %1454 }
0x125d   :  { %v1457_v40 = vpop.permute.xlu0 %1456  ;;  %v1460_v41 = vmul.f32 %v2272_v37, %v1455_v38 }
0x125e   :  { %v1461_v43 = vmul.f32 %v2274_v39, %v1457_v40  ;;  %v2505_v40 = vmov 7  }
0x125f   :  { %1464 = vrot.lane.b32.xlu1 %v1460_v41, %s2496_s27 }
0x1260   :  { %1466 = vrot.lane.b32.xlu0 %v1461_v43, %s2496_s27  ;;  %v1445_v45 = vpop.permute.xlu1 %1444 }
0x1261   :  { %v1447_v46 = vpop.permute.xlu0 %1446  ;;  %v1450_v47 = vmul.f32 %v2272_v37, %v1445_v45 }
0x1262   :  { %v1451_v48 = vmul.f32 %v2274_v39, %v1447_v46 }
0x12d1   :  { %v1465_v49 = vpop.permute.xlu1 %1464 }
0x12d2   :  { %v1467_v50 = vpop.permute.xlu0 %1466  ;;  %v1470_v52 = vadd.f32 %v1465_v49, %v1450_v47 }
0x12d3   :  { %v1471_v53 = vadd.f32 %v1467_v50, %v1451_v48 }
0x12d4   :  { %2275 = vtanh.f32 %v1470_v52  ;;  %v1505_v54 = vrot.slane %v1470_v52, 6 }
0x12d5   :  { %2277 = vtanh.f32 %v1471_v53  ;;  %v1506_v55 = vrot.slane %v1471_v53, 5 }
0x12d7   :  { %v1507_v56 = vsel %vm330_vm3, %v1506_v55, %v1505_v54 }
0x12de   :  { %v2276_v57 = vpop.eup %2275 }
0x12df   :  { %v2278_v58 = vpop.eup %2277  ;;  %1476 = vrot.lane.b32.xlu1 %v2276_v57, %s2495_s23  ;;  %v1739_v57 = vld [vmem:[#allocation8 + $0x8] sm:$0xff] }
0x12e0   :  { %1478 = vrot.lane.b32.xlu0 %v2278_v58, %s2495_s23 }
0x12e3   :  { %1485 = vperm.xlu1 %2163, %v2683_v42  }
0x12e4   :  { %1498 = vperm.xlu0 %2164, %v2688_v51  }
0x12e7   :  { %2166 = vset.pattern.permute.xlu1 %v2505_v40 }
0x12e8   :  { %2165 = vset.pattern.permute.xlu0 %v2505_v40 }
0x1351   :  { %v1477_v59 = vpop.permute.xlu1 %1476 }
0x1352   :  { %v1479_v60 = vpop.permute.xlu0 %1478  ;;  %v1482_v61 = vmul.f32 %v2272_v37, %v1477_v59  ;;  %v1740_v59 = vld [vmem:[#allocation8 + $0x10] sm:$0xff] }
0x1353   :  { %v1483_v62 = vmul.f32 %v2274_v39, %v1479_v60  ;;  %v1741_v60 = vld [vmem:[#allocation8 + $0x18] sm:$0xff] }
0x1354   :  { %v1490_v63 = vrot.slane %v1482_v61, 6  ;;  %v2124_v61 = vpack.c.bf16 %v1741_v60, %v1740_v59 }
0x1355   :  { %v1491_v2 = vrot.slane %v1483_v62, 5 }
0x1357   :  { %v1492_v4 = vsel %vm330_vm3, %v1491_v2, %v1490_v63 }
0x1358   :  { %1493 = vrot.lane.b32.xlu1 %v1492_v4, %s2496_s27 }
0x135c   :  { %1508 = vrot.lane.b32.xlu1 %v1507_v56, %s2497_s1  ;;  %v1738_v56 = vld [vmem:[#allocation8] sm:$0xff] }
0x135d   :  { %v2121_v58 = vpack.c.bf16 %v1739_v57, %v1738_v56 }
0x135f   :  { %2122 = vmatpush3.bf16.msra.mxu1 %v2121_v58 }
0x1360   :  { %2123 = vmatprep.subr.bf16.mxu1 %v2491_v0 }
0x1362   :  { %v1486_v6 = vpop.permute.xlu1 %1485 }
0x1363   :  { %v1499_v7 = vpop.permute.xlu0 %1498  ;;  %2125 = vmatpush3.bf16.msra.mxu1 %v2124_v61 }
0x1364   :  { %v1501_v9 = vmul.f32 %v1499_v7, %v2881_v16  ;;  %v1512_v29 = vmul.f32 %v1499_v7, %v2895_v25 }
0x13ca   :  { %v1494_v11 = vpop.permute.xlu1 %1493 }
0x13cb   :  { %v1496_v14 = vmul.f32 %v1494_v11, %v1486_v6 }
0x13cd   :  { %v2914_v5 = vadd.f32 %v1501_v9, %v1496_v14  ;;  %v1521_v10 = vrot.slane %v1496_v14, %v2696_v3 }
0x13ce   :  { %v1509_v8 = vpop.permute.xlu1 %1508 }
0x13cf   :  { %v1522_v18 = vcombine.high %v1521_v10, %v1521_v10  ;;  %v1529_v19 = vrot.slane %v1521_v10, %v2696_v3  ;;  %2055 = vmatmul.mubr.msk.f32.vlgmr.msra.gmra.mrb[8].mxu0 %vm194_vm4, %v2914_v5  ;;  %v1511_v28 = vmul.f32 %v1509_v8, %v1486_v6 }
0x13d1   :  { %v1536_v13 = vrot.slane %v1522_v18, %v2696_v3  ;;  %1539 = vst.msk [vmem:[#allocation10 + $0x6] sm:$0x1] %vm378_vm5, %v1529_v19  ;;  %v2926_v1 = vadd.f32 %v1512_v29, %v1511_v28 }
0x13d3   :  { %1540 = vst.msk [vmem:[#allocation10 + $0xe] sm:$0x1] %vm378_vm5, %v1536_v13  ;;  %v1636_v12 = vrot.slane %v2926_v1, 1 }
0x14a2   :  { %v1610_v15 = vpop.f32.mrb[8].mxu0 }
0x14a3   :  { %v1615_v20 = vrot.slane %v1610_v15, 1  ;;  %v1616_v16 = vrot.slane %v1610_v15, 2  ;;  %v2056_v22 = vpop.f32.mrb[9].mxu0 }
0x14a5   :  { %v1619_v24 = vadd.f32 %v1615_v20, %v2671_v21  ;;  %v1620_v26 = vadd.f32 %v1616_v16, %v2669_v17  ;;  %v1637_v21 = vrot.slane %v2926_v1, 2 }
0x14a7   :  { %2279 = vtanh.f32 %v1619_v24  ;;  %v1909_v17 = vmul.f32 -1.442695, %v1619_v24  ;;  %v1910_v33 = vmul.f32 -1.442695, %v1620_v26 }
0x14a8   :  { %2281 = vtanh.f32 %v1620_v26 }
0x14a9   :  { %2283 = vpow2.f32 %v1909_v17 }
0x14aa   :  { %2285 = vpow2.f32 %v1910_v33 }
0x14b1   :  { %v2280_v32 = vpop.eup %2279 }
0x14b2   :  { %v2282_v23 = vpop.eup %2281  ;;  %1648 = vrot.lane.b32.xlu0 %v2280_v32, %s2495_s23 }
0x14b3   :  { %1650 = vrot.lane.b32.xlu1 %v2282_v23, %s2495_s23  ;;  %v2284_v25 = vpop.eup %2283 }
0x14b4   :  { %v2286_v34 = vpop.eup %2285  ;;  %v1627_v27 = vadd.f32 1.0, %v2284_v25 }
0x14b5   :  { %v1628_v31 = vadd.f32 1.0, %v2286_v34 }
0x14b6   :  { %1638 = vrot.lane.b32.xlu0 %v1636_v12, %s2496_s27  ;;  %2287 = vrcp.f32 %v1627_v27 }
0x14b7   :  { %1640 = vrot.lane.b32.xlu1 %v1637_v21, %s2496_s27  ;;  %2289 = vrcp.f32 %v1628_v31 }
0x14c0   :  { %v2288_v30 = vpop.eup %2287 }
0x14c1   :  { %v2290_v36 = vpop.eup %2289 }
0x1524   :  { %v1649_v35 = vpop.permute.xlu0 %1648 }
0x1525   :  { %v1654_v37 = vmul.f32 %v2288_v30, %v1649_v35  ;;  %v1651_v38 = vpop.permute.xlu1 %1650 }
0x1526   :  { %v1655_v39 = vmul.f32 %v2290_v36, %v1651_v38 }
0x1527   :  { %1658 = vrot.lane.b32.xlu0 %v1654_v37, %s2496_s27 }
0x1528   :  { %1660 = vrot.lane.b32.xlu1 %v1655_v39, %s2496_s27  ;;  %v1639_v41 = vpop.permute.xlu0 %1638 }
0x1529   :  { %v1641_v43 = vpop.permute.xlu1 %1640  ;;  %v1644_v44 = vmul.f32 %v2288_v30, %v1639_v41 }
0x152a   :  { %v1645_v45 = vmul.f32 %v2290_v36, %v1641_v43 }
0x1599   :  { %v1659_v46 = vpop.permute.xlu0 %1658 }
0x159a   :  { %v1664_v47 = vadd.f32 %v1659_v46, %v1644_v44  ;;  %v1661_v48 = vpop.permute.xlu1 %1660 }
0x159b   :  { %v1665_v49 = vadd.f32 %v1661_v48, %v1645_v45 }
0x159c   :  { %2291 = vtanh.f32 %v1664_v47  ;;  %v1699_v53 = vrot.slane %v1664_v47, 7 }
0x159d   :  { %2293 = vtanh.f32 %v1665_v49  ;;  %v1700_v54 = vrot.slane %v1665_v49, 6 }
0x159f   :  { %v1701_v55 = vsel %vm330_vm3, %v1700_v54, %v1699_v53 }
0x15a6   :  { %v2292_v50 = vpop.eup %2291 }
0x15a7   :  { %v2294_v52 = vpop.eup %2293  ;;  %1670 = vrot.lane.b32.xlu0 %v2292_v50, %s2495_s23 }
0x15a8   :  { %1672 = vrot.lane.b32.xlu1 %v2294_v52, %s2495_s23 }
0x15ab   :  { %1679 = vperm.xlu0 %2165, %v2683_v42  }
0x15ac   :  { %1692 = vperm.xlu1 %2166, %v2688_v51  }
0x15af   :  { %1702 = vrot.lane.b32.xlu0 %v1701_v55, %s2497_s1 }
0x1619   :  { %v1671_v62 = vpop.permute.xlu0 %1670 }
0x161a   :  { %v1676_v63 = vmul.f32 %v2288_v30, %v1671_v62  ;;  %v1673_v2 = vpop.permute.xlu1 %1672 }
0x161b   :  { %v1677_v42 = vmul.f32 %v2290_v36, %v1673_v2 }
0x161c   :  { %v1684_v4 = vrot.slane %v1676_v63, 7 }
0x161d   :  { %v1685_v51 = vrot.slane %v1677_v42, 6 }
0x161f   :  { %v1686_v6 = vsel %vm330_vm3, %v1685_v51, %v1684_v4 }
0x1620   :  { %1687 = vrot.lane.b32.xlu1 %v1686_v6, %s2496_s27 }
0x162a   :  { %v1680_v7 = vpop.permute.xlu0 %1679 }
0x162b   :  { %v1693_v11 = vpop.permute.xlu1 %1692 }
0x162c   :  { %v1706_v14 = vmul.f32 %v1693_v11, %v2926_v1  ;;  %v1695_v19 = vmul.f32 %v1693_v11, %v2914_v5 }
0x162e   :  { %v1703_v9 = vpop.permute.xlu0 %1702 }
0x162f   :  { %v1705_v0 = vmul.f32 %v1703_v9, %v1680_v7 }
0x1631   :  { %v1707_v10 = vadd.f32 %v1706_v14, %v1705_v0 }
0x1633   :  { %1737 = vst.msk [vmem:[#allocation13] sm:$0x3] %vm1735_vm6, %v1707_v10 }
0x1692   :  { %v1688_v18 = vpop.permute.xlu1 %1687 }
0x1693   :  { %v1690_v13 = vmul.f32 %v1688_v18, %v1680_v7 }
0x1695   :  { %v1696_v15 = vadd.f32 %v1695_v19, %v1690_v13  ;;  %v1715_v20 = vrot.slane %v1690_v13, %v2696_v3 }
0x1697   :  { %v1716_v16 = vcombine.high %v1715_v20, %v1715_v20  ;;  %v1723_v22 = vrot.slane %v1715_v20, %v2696_v3  ;;  %2066 = vmatmul.mubr.msk.f32.vlgmr.msra.gmra.mrb[8].mxu1 %vm194_vm4, %v1696_v15  ;;  %1736 = vst.msk [vmem:[#allocation11] sm:$0x3] %vm1735_vm6, %v1696_v15 }
0x1699   :  { %v1730_v24 = vrot.slane %v1716_v16, %v2696_v3  ;;  %1733 = vst.msk [vmem:[#allocation10 + $0x7] sm:$0x1] %vm378_vm5, %v1723_v22 }
0x169b   :  { %1734 = vst.msk [vmem:[#allocation10 + $0xf] sm:$0x1] %vm378_vm5, %v1730_v24 }
0x169c   :  { %2396 = shalt.err (!%p2393_p8)
}
0x169d   :  { %s2397_s16 = scalar_lea.hbm %s3018_s8, 32 }
0x169e   :  { %p2398_p9 = scmp.ne.s32.totalorder %s3018_s8, %s2397_s16  ;;  %p2401_p10 = scmp.lt.u32.totalorder %s2397_s16, %s3018_s8 }
0x16a0   :  { %p2403_p11 = pnand %p2401_p10, %p2398_p9 }
0x16a2   :  { %2406 = shalt.err (!%p2403_p11)
}
0x16a3   :  { %1845 = dma.vmem_to_hbm [thread:$0]  %s1843_s29, 32, %s3018_s8, [#allocation12]  }
0x16a4   :  { %s2507_s14 = smov [#allocation10]   ;;  %s2508_s21 = smov [#allocation13]  }
0x16a5   :  { %s1829_s19 = sshll.u32 %s2507_s14, 4  ;;  %s1852_s3 = sshll.u32 %s2508_s21, 4  ;;  %s1830_s19 = int_to_ptr.vmem [resolvable:$true] %s1829_s19  ;;  %s1853_s3 = int_to_ptr.vmem [resolvable:$true] %s1852_s3 }
0x16a6   :  { %s2407_s20 = scalar_lea.vmem %s1830_s19, 256  ;;  %p2412_p13 = scmp.lt.s32.totalorder %s1830_s19, %s1830_s19 }
0x16a7   :  { %p2408_p12 = scmp.ne.s32.totalorder %s1830_s19, %s2407_s20  ;;  %p2413_p0 = scmp.lt.s32.totalorder %s2407_s20, %s2407_s20 }
0x16a9   :  { %p2414_p1 = por %p2413_p0, %p2412_p13 }
0x16ab   :  { %p2415_p2 = pnand %p2414_p1, %p2408_p12 }
0x16ad   :  { %2418 = shalt.err (!%p2415_p2)
}
0x16ae   :  { %s2419_s23 = scalar_lea.hbm %s3017_s7, 256 }
0x16af   :  { %p2420_p3 = scmp.ne.s32.totalorder %s3017_s7, %s2419_s23  ;;  %p2423_p4 = scmp.lt.u32.totalorder %s2419_s23, %s3017_s7 }
0x16b1   :  { %p2425_p5 = pnand %p2423_p4, %p2420_p3 }
0x16b3   :  { %2428 = shalt.err (!%p2425_p5)
}
0x16b4   :  { %1835 = dma.vmem_to_hbm [thread:$0]  %s1830_s19, 256, %s3017_s7, [#allocation4], %s2487_s25, %s2487_s25, %s2488_s26  }
0x16b5   :  { %s2429_s29 = scalar_lea.vmem %s1853_s3, 32  ;;  %p2434_p7 = scmp.lt.s32.totalorder %s1853_s3, %s1853_s3 }
0x16b6   :  { %p2430_p6 = scmp.ne.s32.totalorder %s1853_s3, %s2429_s29  ;;  %p2435_p8 = scmp.lt.s32.totalorder %s2429_s29, %s2429_s29 }
0x16b8   :  { %p2436_p9 = por %p2435_p8, %p2434_p7 }
0x16ba   :  { %p2437_p10 = pnand %p2436_p9, %p2430_p6 }
0x16bc   :  { %2440 = shalt.err (!%p2437_p10)
}
0x16bd   :  { %s2441_s0 = scalar_lea.hbm %s3019_s9, 32 }
0x16be   :  { %p2442_p11 = scmp.ne.s32.totalorder %s3019_s9, %s2441_s0  ;;  %p2445_p12 = scmp.lt.u32.totalorder %s2441_s0, %s3019_s9 }
0x16c0   :  { %p2447_p13 = pnand %p2445_p12, %p2442_p11 }
0x16c2   :  { %2450 = shalt.err (!%p2447_p13)
}
0x16c3   :  { %1855 = dma.vmem_to_hbm [thread:$0]  %s1853_s3, 32, %s3019_s9, [#allocation12]   ;;  %v1911_v3 = vld [vmem:[%s3016_s6] ss:$0 sm:$0xff] }
0x16c4   :  { %s2509_s18 = smov [#allocation14]  }
0x16c5   :  { %s1862_s2 = sshll.u32 %s2509_s18, 4  ;;  %s1863_s2 = int_to_ptr.vmem [resolvable:$true] %s1862_s2 }
0x16c6   :  { %s2451_s14 = scalar_lea.vmem %s1863_s2, 32  ;;  %p2456_p1 = scmp.lt.s32.totalorder %s1863_s2, %s1863_s2 }
0x16c7   :  { %p2452_p0 = scmp.ne.s32.totalorder %s1863_s2, %s2451_s14  ;;  %p2457_p2 = scmp.lt.s32.totalorder %s2451_s14, %s2451_s14 }
0x16c9   :  { %p2458_p3 = por %p2457_p2, %p2456_p1 }
0x16cb   :  { %p2459_p4 = pnand %p2458_p3, %p2452_p0 }
0x176a   :  { %v1818_v5 = vpop.f32.mrb[8].mxu1 }
0x176b   :  { %v1819_v26 = vadd.f32 %v1911_v3, %v1818_v5  ;;  %v2067_v8 = vpop.f32.mrb[9].mxu1 }
0x176d   :  { %2295 = vtanh.f32 %v1819_v26 }
0x1777   :  { %v2296_v28 = vpop.eup %2295 }
0x1778   :  { %1823 = vst.msk [vmem:[#allocation14] sm:$0x3] %vm1735_vm6, %v2296_v28 }
0x1779   :  { %2462 = shalt.err (!%p2459_p4)
}
0x177a   :  { %s2463_s6 = scalar_lea.hbm %s3020_s10, 32 }
0x177b   :  { %p2464_p5 = scmp.ne.s32.totalorder %s3020_s10, %s2463_s6  ;;  %p2467_p6 = scmp.lt.u32.totalorder %s2463_s6, %s3020_s10 }
0x177d   :  { %p2469_p7 = pnand %p2467_p6, %p2464_p5 }
0x177f   :  { %2472 = shalt.err (!%p2469_p7)
}
0x1780   :  { %1865 = dma.vmem_to_hbm [thread:$0]  %s1863_s2, 32, %s3020_s10, [#allocation15]  }
0x1781   :  { %2479 = dma.done.wait [#allocation4], 256  }
0x1782   :  { %2480 = vsyncadd [#allocation4], 4294967040 }
0x1783   :  { %2481 = dma.done.wait [#allocation12], 64  }
0x1784   :  { %2482 = vsyncadd [#allocation12], 4294967232 }
0x1785   :  { %2483 = dma.done.wait [#allocation15], 32  }
0x1786   :  { %2484 = vsyncadd [#allocation15], 4294967264 }
0x1787   :  { %1878 = vsyncpa [#allocation3], 1 }
0x1788   :  { %1879 = vsyncpa [#allocation6], 1 }
0x1789   :  { %1880 = vsyncpa [#allocation9], 1 }
0x178a   :  { %1881 = vsyncpa [#allocation4], 1 }
0x178b   :  { %1882 = vsyncpa [#allocation12], 1 }
0x178c   :  { %1883 = vsyncpa [#allocation15], 1 }

</bundles_post_ra>
